<compile_context>
chip_gen: v7x
topology: tpu7x:2x2x1
jax: 0.10.0
libtpu: 0.0.40
codegen_flags: <defaults>
</compile_context>

<pallas_src>
import functools

import jax
import jax.numpy as jnp
from jax.experimental import pallas as pl
from jax.experimental.pallas import tpu as pltpu

EMBED_DIM = 32
NUM_HEADS = 4
HEAD_DIM = EMBED_DIM // NUM_HEADS


def _cross_attention_kernel(q_ref, kv_ref,
                            wq_ref, bq_ref,
                            wkv_ref, bkv_ref,
                            wo_ref, bo_ref,
                            out_ref,
                            *, num_heads, head_dim, tb, sq, skv, embed):
    """One batch tile (tb elements) per grid step; all matmuls / StableMax on-chip."""
    # Flatten the batch tile so the projections are single (tb*seq, E) MXU slabs.
    q2 = q_ref[...].reshape(tb * sq, embed)
    kv2 = kv_ref[...].reshape(tb * skv, embed)

    bq = bq_ref[...]    # (1, E)
    bkv = bkv_ref[...]  # (1, 2E)
    bo = bo_ref[...]    # (1, E)

    # Q projection and fused K|V projection.
    q = jnp.dot(q2, wq_ref[...], preferred_element_type=jnp.float32) + bq
    kv = jnp.dot(kv2, wkv_ref[...], preferred_element_type=jnp.float32) + bkv

    q3 = q.reshape(tb, sq, embed)
    k3 = kv[:, :embed].reshape(tb, skv, embed)
    v3 = kv[:, embed:].reshape(tb, skv, embed)

    scale = 1.0 / (head_dim ** 0.5)

    # out = concat_h(ctx_h) @ Wo + bo  ==  sum_h ctx_h @ Wo[h*hd:(h+1)*hd, :] + bo
    # -> no head concat (which would be pure lane-shuffle work).
    out_acc = jnp.broadcast_to(bo.astype(jnp.float32), (tb * sq, embed))
    for h in range(num_heads):
        lo = h * head_dim
        hi = lo + head_dim
        qh = q3[:, :, lo:hi]   # (tb, sq, hd)
        kh = k3[:, :, lo:hi]   # (tb, skv, hd)
        vh = v3[:, :, lo:hi]   # (tb, skv, hd)

        # Scores batched over the whole batch tile (single batch-dim einsum).
        scores = jnp.einsum('bqd,bkd->bqk', qh, kh,
                            preferred_element_type=jnp.float32) * scale

        # StableMax: s(x) = x+1 (x>=0), 1/(1-x) (x<0); normalize over last axis.
        s = jnp.where(scores >= 0.0, scores + 1.0, 1.0 / (1.0 - scores))
        row_sum = jnp.sum(s, axis=-1, keepdims=True)
        attn = s * pl.reciprocal(row_sum, approx=True)  # EUP reciprocal; VPU stays free.
        # TODO(synk): nn.Dropout is identity here (eval semantics); no RNG mask applied.
        # TODO(synk): KV caching (use_kv_cache) is stateful and not implemented.

        ctx_h = jnp.einsum('bqk,bkd->bqd', attn, vh,
                           preferred_element_type=jnp.float32)  # (tb, sq, hd)
        out_acc = out_acc + jnp.dot(ctx_h.reshape(tb * sq, head_dim),
                                    wo_ref[lo:hi, :],
                                    preferred_element_type=jnp.float32)

    out_ref[...] = out_acc.reshape(tb, sq, embed).astype(out_ref.dtype)


def cross_attention(query, key_value, params, *, batch_tile=None):
    """query: (B, Sq, E), key_value: (B, Skv, E) -> (B, Sq, E)."""
    B, Sq, E = query.shape
    Bk, Skv, Ek = key_value.shape
    assert E == EMBED_DIM and Ek == E and Bk == B

    wq, bq, wk, bk, wv, bv, wo, bo = params
    # Fuse the K and V projections host-side: one (E, 2E) matmul in the kernel.
    wkv = jnp.concatenate([wk, wv], axis=1)   # (E, 2E)
    bkv = jnp.concatenate([bk, bv], axis=1)   # (1, 2E)

    if batch_tile is None:
        # Target ~128 projection rows per step, but keep >= 2 grid steps so a v7x
        # megacore can shard the 'parallel' batch axis over both TensorCores.
        batch_tile = max(1, min(pl.cdiv(128, Sq), max(1, B // 2)))
    tb = max(1, min(batch_tile, B))
    grid_b = (B + tb - 1) // tb
    pad = grid_b * tb - B
    if pad:
        query = jnp.pad(query, ((0, pad), (0, 0), (0, 0)))
        key_value = jnp.pad(key_value, ((0, pad), (0, 0), (0, 0)))

    kernel = functools.partial(
        _cross_attention_kernel,
        num_heads=NUM_HEADS, head_dim=HEAD_DIM,
        tb=tb, sq=Sq, skv=Skv, embed=E)

    out = pl.pallas_call(
        kernel,
        out_shape=jax.ShapeDtypeStruct((grid_b * tb, Sq, E), query.dtype),
        grid=(grid_b,),
        in_specs=[
            pl.BlockSpec((tb, Sq, E), lambda b: (b, 0, 0)),    # query tile
            pl.BlockSpec((tb, Skv, E), lambda b: (b, 0, 0)),   # key_value tile
            pl.BlockSpec((E, E), lambda b: (0, 0)),            # Wq
            pl.BlockSpec((1, E), lambda b: (0, 0)),            # bq
            pl.BlockSpec((E, 2 * E), lambda b: (0, 0)),        # Wkv (fused)
            pl.BlockSpec((1, 2 * E), lambda b: (0, 0)),        # bkv (fused)
            pl.BlockSpec((E, E), lambda b: (0, 0)),            # Wo
            pl.BlockSpec((1, E), lambda b: (0, 0)),            # bo
        ],
        out_specs=pl.BlockSpec((tb, Sq, E), lambda b: (b, 0, 0)),
        compiler_params=pltpu.CompilerParams(
            dimension_semantics=("parallel",)),
    )(query, key_value, wq, bq, wkv, bkv, wo, bo)

    if pad:
        out = out[:B]
    return out


def _init_linear(key, in_dim, out_dim):
    """PyTorch-like nn.Linear init, but returned as (W^T [in,out], b [1,out])."""
    kw, kb = jax.random.split(key)
    bound = 1.0 / (in_dim ** 0.5)
    w_t = jax.random.uniform(kw, (in_dim, out_dim), jnp.float32, -bound, bound)
    b = jax.random.uniform(kb, (1, out_dim), jnp.float32, -bound, bound)
    return w_t, b


def _reference(query, key_value, params):
    """Plain-JAX reference for correctness checking."""
    wq, bq, wk, bk, wv, bv, wo, bo = params
    B, Sq, E = query.shape
    Skv = key_value.shape[1]
    q = query @ wq + bq
    k = key_value @ wk + bk
    v = key_value @ wv + bv
    q = q.reshape(B, Sq, NUM_HEADS, HEAD_DIM).transpose(0, 2, 1, 3)
    k = k.reshape(B, Skv, NUM_HEADS, HEAD_DIM).transpose(0, 2, 1, 3)
    v = v.reshape(B, Skv, NUM_HEADS, HEAD_DIM).transpose(0, 2, 1, 3)
    scores = jnp.einsum("bhqd,bhkd->bhqk", q, k) / (HEAD_DIM ** 0.5)
    s = jnp.where(scores >= 0.0, scores + 1.0, 1.0 / (1.0 - scores))
    attn = s / jnp.sum(s, axis=-1, keepdims=True)
    ctx = jnp.einsum("bhqk,bhkd->bhqd", attn, v)
    ctx = ctx.transpose(0, 2, 1, 3).reshape(B, Sq, E)
    return ctx @ wo + bo


if __name__ == "__main__":
    key = jax.random.PRNGKey(0)
    k_q, k_kv, k_p1, k_p2, k_p3, k_p4 = jax.random.split(key, 6)

    B, Sq, Skv = 8, 8, 8
    query = jax.random.normal(k_q, (B, Sq, EMBED_DIM), jnp.float32)
    key_value = jax.random.normal(k_kv, (B, Skv, EMBED_DIM), jnp.float32)

    wq, bq = _init_linear(k_p1, EMBED_DIM, EMBED_DIM)
    wk, bk = _init_linear(k_p2, EMBED_DIM, EMBED_DIM)
    wv, bv = _init_linear(k_p3, EMBED_DIM, EMBED_DIM)
    wo, bo = _init_linear(k_p4, EMBED_DIM, EMBED_DIM)
    params = (wq, bq, wk, bk, wv, bv, wo, bo)

    out = cross_attention(query, key_value, params)
    out = jax.block_until_ready(out)

    ref = _reference(query, key_value, params)
    assert out.shape == (B, Sq, EMBED_DIM)
    # Tolerance relaxed to 2e-3 because the StableMax row-sum normalization uses
    # the EUP approximate reciprocal (pl.reciprocal(..., approx=True)).
    assert jnp.allclose(out, ref, atol=2e-3, rtol=2e-3), "mismatch vs reference"

    print("KERNEL_OK")
</pallas_src>

<mosaic_0001>
module attributes {stable_mosaic.version = 11 : i64} {
  func.func @_cross_attention_kernel(%arg0: i32, %arg1: memref<4x8x32xf32, #tpu.memory_space<vmem>>, %arg2: memref<4x8x32xf32, #tpu.memory_space<vmem>>, %arg3: memref<32x32xf32, #tpu.memory_space<vmem>>, %arg4: memref<1x32xf32, #tpu.memory_space<vmem>>, %arg5: memref<32x64xf32, #tpu.memory_space<vmem>>, %arg6: memref<1x64xf32, #tpu.memory_space<vmem>>, %arg7: memref<32x32xf32, #tpu.memory_space<vmem>>, %arg8: memref<1x32xf32, #tpu.memory_space<vmem>>, %arg9: memref<4x8x32xf32, #tpu.memory_space<vmem>>) attributes {dimension_semantics = [#tpu.dimension_semantics<parallel>], iteration_bounds = array<i64: 2>, scalar_prefetch = 0 : i64, scratch_operands = 0 : i64, tpu.core_type = #tpu.core_type<tc>, window_params = [{transform_indices = @transform_0, window_bounds = array<i64: 4, 8, 32>}, {transform_indices = @transform_1, window_bounds = array<i64: 4, 8, 32>}, {pipeline_mode = #tpu.pipeline_mode<synchronous>, transform_indices = @transform_2, window_bounds = array<i64: 32, 32>}, {pipeline_mode = #tpu.pipeline_mode<synchronous>, transform_indices = @transform_3, window_bounds = array<i64: 1, 32>}, {pipeline_mode = #tpu.pipeline_mode<synchronous>, transform_indices = @transform_4, window_bounds = array<i64: 32, 64>}, {pipeline_mode = #tpu.pipeline_mode<synchronous>, transform_indices = @transform_5, window_bounds = array<i64: 1, 64>}, {pipeline_mode = #tpu.pipeline_mode<synchronous>, transform_indices = @transform_6, window_bounds = array<i64: 32, 32>}, {pipeline_mode = #tpu.pipeline_mode<synchronous>, transform_indices = @transform_7, window_bounds = array<i64: 1, 32>}, {transform_indices = @transform_8, window_bounds = array<i64: 4, 8, 32>}]} {
    %c0 = arith.constant 0 : index
    %c0_0 = arith.constant 0 : index
    %c0_1 = arith.constant 0 : index
    %0 = vector.load %arg1[%c0, %c0_0, %c0_1] : memref<4x8x32xf32, #tpu.memory_space<vmem>>, vector<4x8x32xf32>
    %1 = vector.shape_cast %0 : vector<4x8x32xf32> to vector<32x32xf32>
    %c0_2 = arith.constant 0 : index
    %c0_3 = arith.constant 0 : index
    %c0_4 = arith.constant 0 : index
    %2 = vector.load %arg2[%c0_2, %c0_3, %c0_4] : memref<4x8x32xf32, #tpu.memory_space<vmem>>, vector<4x8x32xf32>
    %3 = vector.shape_cast %2 : vector<4x8x32xf32> to vector<32x32xf32>
    %c0_5 = arith.constant 0 : index
    %c0_6 = arith.constant 0 : index
    %4 = vector.load %arg4[%c0_5, %c0_6] : memref<1x32xf32, #tpu.memory_space<vmem>>, vector<1x32xf32>
    %c0_7 = arith.constant 0 : index
    %c0_8 = arith.constant 0 : index
    %5 = vector.load %arg6[%c0_7, %c0_8] : memref<1x64xf32, #tpu.memory_space<vmem>>, vector<1x64xf32>
    %c0_9 = arith.constant 0 : index
    %c0_10 = arith.constant 0 : index
    %6 = vector.load %arg8[%c0_9, %c0_10] : memref<1x32xf32, #tpu.memory_space<vmem>>, vector<1x32xf32>
    %c0_11 = arith.constant 0 : index
    %c0_12 = arith.constant 0 : index
    %7 = vector.load %arg3[%c0_11, %c0_12] : memref<32x32xf32, #tpu.memory_space<vmem>>, vector<32x32xf32>
    %cst = arith.constant dense<0.000000e+00> : vector<32x32xf32>
    %8 = tpu.matmul %1, %7, %cst {dimension_numbers = #tpu.dot_dimension_numbers<[1], [0], [0], [1], [0, 0, 1, 1], [], []>} : vector<32x32xf32>, vector<32x32xf32>, vector<32x32xf32> -> vector<32x32xf32>
    %9 = vector.broadcast %4 : vector<1x32xf32> to vector<32x32xf32>
    %10 = arith.addf %8, %9 : vector<32x32xf32>
    %c0_13 = arith.constant 0 : index
    %c0_14 = arith.constant 0 : index
    %11 = vector.load %arg5[%c0_13, %c0_14] : memref<32x64xf32, #tpu.memory_space<vmem>>, vector<32x64xf32>
    %cst_15 = arith.constant dense<0.000000e+00> : vector<32x64xf32>
    %12 = tpu.matmul %3, %11, %cst_15 {dimension_numbers = #tpu.dot_dimension_numbers<[1], [0], [0], [1], [0, 0, 1, 1], [], []>} : vector<32x32xf32>, vector<32x64xf32>, vector<32x64xf32> -> vector<32x64xf32>
    %13 = vector.broadcast %5 : vector<1x64xf32> to vector<32x64xf32>
    %14 = arith.addf %12, %13 : vector<32x64xf32>
    %15 = vector.shape_cast %10 : vector<32x32xf32> to vector<4x8x32xf32>
    %16 = vector.extract_strided_slice %14 {offsets = [0, 0], sizes = [32, 32], strides = [1, 1]} : vector<32x64xf32> to vector<32x32xf32>
    %17 = vector.shape_cast %16 : vector<32x32xf32> to vector<4x8x32xf32>
    %18 = vector.extract_strided_slice %14 {offsets = [0, 32], sizes = [32, 32], strides = [1, 1]} : vector<32x64xf32> to vector<32x32xf32>
    %19 = vector.shape_cast %18 : vector<32x32xf32> to vector<4x8x32xf32>
    %20 = vector.shape_cast %6 : vector<1x32xf32> to vector<1x32xf32>
    %21 = vector.broadcast %20 : vector<1x32xf32> to vector<32x32xf32>
    %22 = vector.extract_strided_slice %15 {offsets = [0, 0, 0], sizes = [4, 8, 8], strides = [1, 1, 1]} : vector<4x8x32xf32> to vector<4x8x8xf32>
    %23 = vector.extract_strided_slice %17 {offsets = [0, 0, 0], sizes = [4, 8, 8], strides = [1, 1, 1]} : vector<4x8x32xf32> to vector<4x8x8xf32>
    %24 = vector.extract_strided_slice %19 {offsets = [0, 0, 0], sizes = [4, 8, 8], strides = [1, 1, 1]} : vector<4x8x32xf32> to vector<4x8x8xf32>
    "tpu.trace_start"() <{level = 10 : i32, message = "bqd,bkd->bqk"}> : () -> ()
    %cst_16 = arith.constant dense<0.000000e+00> : vector<4x8x8xf32>
    %25 = tpu.matmul %22, %23, %cst_16 {dimension_numbers = #tpu.dot_dimension_numbers<[2], [2], [1], [1], [0, 0, 0, 1, 1, 1], [0], [0]>} : vector<4x8x8xf32>, vector<4x8x8xf32>, vector<4x8x8xf32> -> vector<4x8x8xf32>
    "tpu.trace_stop"() : () -> ()
    %cst_17 = arith.constant 0.353553385 : f32
    %26 = vector.broadcast %cst_17 : f32 to vector<4x8x8xf32>
    %27 = arith.mulf %25, %26 : vector<4x8x8xf32>
    %cst_18 = arith.constant 0.000000e+00 : f32
    %28 = vector.broadcast %cst_18 : f32 to vector<4x8x8xf32>
    %29 = arith.cmpf oge, %27, %28 : vector<4x8x8xf32>
    %cst_19 = arith.constant 1.000000e+00 : f32
    %30 = vector.broadcast %cst_19 : f32 to vector<4x8x8xf32>
    %31 = arith.addf %27, %30 : vector<4x8x8xf32>
    %cst_20 = arith.constant 1.000000e+00 : f32
    %32 = vector.broadcast %cst_20 : f32 to vector<4x8x8xf32>
    %33 = arith.subf %32, %27 : vector<4x8x8xf32>
    %cst_21 = arith.constant 1.000000e+00 : f32
    %34 = vector.broadcast %cst_21 : f32 to vector<4x8x8xf32>
    %35 = arith.divf %34, %33 : vector<4x8x8xf32>
    %36 = arith.select %29, %31, %35 : vector<4x8x8xi1>, vector<4x8x8xf32>
    %cst_22 = arith.constant dense<0.000000e+00> : vector<4x8xf32>
    %37 = vector.multi_reduction <add>, %36, %cst_22 [2] : vector<4x8x8xf32> to vector<4x8xf32>
    %38 = vector.shape_cast %37 : vector<4x8xf32> to vector<4x8x1xf32>
    %39 = tpu.reciprocal %38 {approx = true} : vector<4x8x1xf32> -> vector<4x8x1xf32>
    %40 = vector.broadcast %39 : vector<4x8x1xf32> to vector<4x8x8xf32>
    %41 = arith.mulf %36, %40 : vector<4x8x8xf32>
    "tpu.trace_start"() <{level = 10 : i32, message = "bqk,bkd->bqd"}> : () -> ()
    %cst_23 = arith.constant dense<0.000000e+00> : vector<4x8x8xf32>
    %42 = tpu.matmul %41, %24, %cst_23 {dimension_numbers = #tpu.dot_dimension_numbers<[2], [1], [1], [2], [0, 0, 0, 1, 1, 2], [0], [0]>} : vector<4x8x8xf32>, vector<4x8x8xf32>, vector<4x8x8xf32> -> vector<4x8x8xf32>
    "tpu.trace_stop"() : () -> ()
    %43 = vector.shape_cast %42 : vector<4x8x8xf32> to vector<32x8xf32>
    %c0_24 = arith.constant 0 : index
    %c0_25 = arith.constant 0 : index
    %44 = vector.load %arg7[%c0_24, %c0_25] : memref<32x32xf32, #tpu.memory_space<vmem>>, vector<8x32xf32>
    %cst_26 = arith.constant dense<0.000000e+00> : vector<32x32xf32>
    %45 = tpu.matmul %43, %44, %cst_26 {dimension_numbers = #tpu.dot_dimension_numbers<[1], [0], [0], [1], [0, 0, 1, 1], [], []>} : vector<32x8xf32>, vector<8x32xf32>, vector<32x32xf32> -> vector<32x32xf32>
    %46 = arith.addf %21, %45 : vector<32x32xf32>
    %47 = vector.extract_strided_slice %15 {offsets = [0, 0, 8], sizes = [4, 8, 8], strides = [1, 1, 1]} : vector<4x8x32xf32> to vector<4x8x8xf32>
    %48 = vector.extract_strided_slice %17 {offsets = [0, 0, 8], sizes = [4, 8, 8], strides = [1, 1, 1]} : vector<4x8x32xf32> to vector<4x8x8xf32>
    %49 = vector.extract_strided_slice %19 {offsets = [0, 0, 8], sizes = [4, 8, 8], strides = [1, 1, 1]} : vector<4x8x32xf32> to vector<4x8x8xf32>
    "tpu.trace_start"() <{level = 10 : i32, message = "bqd,bkd->bqk"}> : () -> ()
    %cst_27 = arith.constant dense<0.000000e+00> : vector<4x8x8xf32>
    %50 = tpu.matmul %47, %48, %cst_27 {dimension_numbers = #tpu.dot_dimension_numbers<[2], [2], [1], [1], [0, 0, 0, 1, 1, 1], [0], [0]>} : vector<4x8x8xf32>, vector<4x8x8xf32>, vector<4x8x8xf32> -> vector<4x8x8xf32>
    "tpu.trace_stop"() : () -> ()
    %cst_28 = arith.constant 0.353553385 : f32
    %51 = vector.broadcast %cst_28 : f32 to vector<4x8x8xf32>
    %52 = arith.mulf %50, %51 : vector<4x8x8xf32>
    %cst_29 = arith.constant 0.000000e+00 : f32
    %53 = vector.broadcast %cst_29 : f32 to vector<4x8x8xf32>
    %54 = arith.cmpf oge, %52, %53 : vector<4x8x8xf32>
    %cst_30 = arith.constant 1.000000e+00 : f32
    %55 = vector.broadcast %cst_30 : f32 to vector<4x8x8xf32>
    %56 = arith.addf %52, %55 : vector<4x8x8xf32>
    %cst_31 = arith.constant 1.000000e+00 : f32
    %57 = vector.broadcast %cst_31 : f32 to vector<4x8x8xf32>
    %58 = arith.subf %57, %52 : vector<4x8x8xf32>
    %cst_32 = arith.constant 1.000000e+00 : f32
    %59 = vector.broadcast %cst_32 : f32 to vector<4x8x8xf32>
    %60 = arith.divf %59, %58 : vector<4x8x8xf32>
    %61 = arith.select %54, %56, %60 : vector<4x8x8xi1>, vector<4x8x8xf32>
    %cst_33 = arith.constant dense<0.000000e+00> : vector<4x8xf32>
    %62 = vector.multi_reduction <add>, %61, %cst_33 [2] : vector<4x8x8xf32> to vector<4x8xf32>
    %63 = vector.shape_cast %62 : vector<4x8xf32> to vector<4x8x1xf32>
    %64 = tpu.reciprocal %63 {approx = true} : vector<4x8x1xf32> -> vector<4x8x1xf32>
    %65 = vector.broadcast %64 : vector<4x8x1xf32> to vector<4x8x8xf32>
    %66 = arith.mulf %61, %65 : vector<4x8x8xf32>
    "tpu.trace_start"() <{level = 10 : i32, message = "bqk,bkd->bqd"}> : () -> ()
    %cst_34 = arith.constant dense<0.000000e+00> : vector<4x8x8xf32>
    %67 = tpu.matmul %66, %49, %cst_34 {dimension_numbers = #tpu.dot_dimension_numbers<[2], [1], [1], [2], [0, 0, 0, 1, 1, 2], [0], [0]>} : vector<4x8x8xf32>, vector<4x8x8xf32>, vector<4x8x8xf32> -> vector<4x8x8xf32>
    "tpu.trace_stop"() : () -> ()
    %68 = vector.shape_cast %67 : vector<4x8x8xf32> to vector<32x8xf32>
    %c8 = arith.constant 8 : index
    %c0_35 = arith.constant 0 : index
    %69 = vector.load %arg7[%c8, %c0_35] : memref<32x32xf32, #tpu.memory_space<vmem>>, vector<8x32xf32>
    %cst_36 = arith.constant dense<0.000000e+00> : vector<32x32xf32>
    %70 = tpu.matmul %68, %69, %cst_36 {dimension_numbers = #tpu.dot_dimension_numbers<[1], [0], [0], [1], [0, 0, 1, 1], [], []>} : vector<32x8xf32>, vector<8x32xf32>, vector<32x32xf32> -> vector<32x32xf32>
    %71 = arith.addf %46, %70 : vector<32x32xf32>
    %72 = vector.extract_strided_slice %15 {offsets = [0, 0, 16], sizes = [4, 8, 8], strides = [1, 1, 1]} : vector<4x8x32xf32> to vector<4x8x8xf32>
    %73 = vector.extract_strided_slice %17 {offsets = [0, 0, 16], sizes = [4, 8, 8], strides = [1, 1, 1]} : vector<4x8x32xf32> to vector<4x8x8xf32>
    %74 = vector.extract_strided_slice %19 {offsets = [0, 0, 16], sizes = [4, 8, 8], strides = [1, 1, 1]} : vector<4x8x32xf32> to vector<4x8x8xf32>
    "tpu.trace_start"() <{level = 10 : i32, message = "bqd,bkd->bqk"}> : () -> ()
    %cst_37 = arith.constant dense<0.000000e+00> : vector<4x8x8xf32>
    %75 = tpu.matmul %72, %73, %cst_37 {dimension_numbers = #tpu.dot_dimension_numbers<[2], [2], [1], [1], [0, 0, 0, 1, 1, 1], [0], [0]>} : vector<4x8x8xf32>, vector<4x8x8xf32>, vector<4x8x8xf32> -> vector<4x8x8xf32>
    "tpu.trace_stop"() : () -> ()
    %cst_38 = arith.constant 0.353553385 : f32
    %76 = vector.broadcast %cst_38 : f32 to vector<4x8x8xf32>
    %77 = arith.mulf %75, %76 : vector<4x8x8xf32>
    %cst_39 = arith.constant 0.000000e+00 : f32
    %78 = vector.broadcast %cst_39 : f32 to vector<4x8x8xf32>
    %79 = arith.cmpf oge, %77, %78 : vector<4x8x8xf32>
    %cst_40 = arith.constant 1.000000e+00 : f32
    %80 = vector.broadcast %cst_40 : f32 to vector<4x8x8xf32>
    %81 = arith.addf %77, %80 : vector<4x8x8xf32>
    %cst_41 = arith.constant 1.000000e+00 : f32
    %82 = vector.broadcast %cst_41 : f32 to vector<4x8x8xf32>
    %83 = arith.subf %82, %77 : vector<4x8x8xf32>
    %cst_42 = arith.constant 1.000000e+00 : f32
    %84 = vector.broadcast %cst_42 : f32 to vector<4x8x8xf32>
    %85 = arith.divf %84, %83 : vector<4x8x8xf32>
    %86 = arith.select %79, %81, %85 : vector<4x8x8xi1>, vector<4x8x8xf32>
    %cst_43 = arith.constant dense<0.000000e+00> : vector<4x8xf32>
    %87 = vector.multi_reduction <add>, %86, %cst_43 [2] : vector<4x8x8xf32> to vector<4x8xf32>
    %88 = vector.shape_cast %87 : vector<4x8xf32> to vector<4x8x1xf32>
    %89 = tpu.reciprocal %88 {approx = true} : vector<4x8x1xf32> -> vector<4x8x1xf32>
    %90 = vector.broadcast %89 : vector<4x8x1xf32> to vector<4x8x8xf32>
    %91 = arith.mulf %86, %90 : vector<4x8x8xf32>
    "tpu.trace_start"() <{level = 10 : i32, message = "bqk,bkd->bqd"}> : () -> ()
    %cst_44 = arith.constant dense<0.000000e+00> : vector<4x8x8xf32>
    %92 = tpu.matmul %91, %74, %cst_44 {dimension_numbers = #tpu.dot_dimension_numbers<[2], [1], [1], [2], [0, 0, 0, 1, 1, 2], [0], [0]>} : vector<4x8x8xf32>, vector<4x8x8xf32>, vector<4x8x8xf32> -> vector<4x8x8xf32>
    "tpu.trace_stop"() : () -> ()
    %93 = vector.shape_cast %92 : vector<4x8x8xf32> to vector<32x8xf32>
    %c16 = arith.constant 16 : index
    %c0_45 = arith.constant 0 : index
    %94 = vector.load %arg7[%c16, %c0_45] : memref<32x32xf32, #tpu.memory_space<vmem>>, vector<8x32xf32>
    %cst_46 = arith.constant dense<0.000000e+00> : vector<32x32xf32>
    %95 = tpu.matmul %93, %94, %cst_46 {dimension_numbers = #tpu.dot_dimension_numbers<[1], [0], [0], [1], [0, 0, 1, 1], [], []>} : vector<32x8xf32>, vector<8x32xf32>, vector<32x32xf32> -> vector<32x32xf32>
    %96 = arith.addf %71, %95 : vector<32x32xf32>
    %97 = vector.extract_strided_slice %15 {offsets = [0, 0, 24], sizes = [4, 8, 8], strides = [1, 1, 1]} : vector<4x8x32xf32> to vector<4x8x8xf32>
    %98 = vector.extract_strided_slice %17 {offsets = [0, 0, 24], sizes = [4, 8, 8], strides = [1, 1, 1]} : vector<4x8x32xf32> to vector<4x8x8xf32>
    %99 = vector.extract_strided_slice %19 {offsets = [0, 0, 24], sizes = [4, 8, 8], strides = [1, 1, 1]} : vector<4x8x32xf32> to vector<4x8x8xf32>
    "tpu.trace_start"() <{level = 10 : i32, message = "bqd,bkd->bqk"}> : () -> ()
    %cst_47 = arith.constant dense<0.000000e+00> : vector<4x8x8xf32>
    %100 = tpu.matmul %97, %98, %cst_47 {dimension_numbers = #tpu.dot_dimension_numbers<[2], [2], [1], [1], [0, 0, 0, 1, 1, 1], [0], [0]>} : vector<4x8x8xf32>, vector<4x8x8xf32>, vector<4x8x8xf32> -> vector<4x8x8xf32>
    "tpu.trace_stop"() : () -> ()
    %cst_48 = arith.constant 0.353553385 : f32
    %101 = vector.broadcast %cst_48 : f32 to vector<4x8x8xf32>
    %102 = arith.mulf %100, %101 : vector<4x8x8xf32>
    %cst_49 = arith.constant 0.000000e+00 : f32
    %103 = vector.broadcast %cst_49 : f32 to vector<4x8x8xf32>
    %104 = arith.cmpf oge, %102, %103 : vector<4x8x8xf32>
    %cst_50 = arith.constant 1.000000e+00 : f32
    %105 = vector.broadcast %cst_50 : f32 to vector<4x8x8xf32>
    %106 = arith.addf %102, %105 : vector<4x8x8xf32>
    %cst_51 = arith.constant 1.000000e+00 : f32
    %107 = vector.broadcast %cst_51 : f32 to vector<4x8x8xf32>
    %108 = arith.subf %107, %102 : vector<4x8x8xf32>
    %cst_52 = arith.constant 1.000000e+00 : f32
    %109 = vector.broadcast %cst_52 : f32 to vector<4x8x8xf32>
    %110 = arith.divf %109, %108 : vector<4x8x8xf32>
    %111 = arith.select %104, %106, %110 : vector<4x8x8xi1>, vector<4x8x8xf32>
    %cst_53 = arith.constant dense<0.000000e+00> : vector<4x8xf32>
    %112 = vector.multi_reduction <add>, %111, %cst_53 [2] : vector<4x8x8xf32> to vector<4x8xf32>
    %113 = vector.shape_cast %112 : vector<4x8xf32> to vector<4x8x1xf32>
    %114 = tpu.reciprocal %113 {approx = true} : vector<4x8x1xf32> -> vector<4x8x1xf32>
    %115 = vector.broadcast %114 : vector<4x8x1xf32> to vector<4x8x8xf32>
    %116 = arith.mulf %111, %115 : vector<4x8x8xf32>
    "tpu.trace_start"() <{level = 10 : i32, message = "bqk,bkd->bqd"}> : () -> ()
    %cst_54 = arith.constant dense<0.000000e+00> : vector<4x8x8xf32>
    %117 = tpu.matmul %116, %99, %cst_54 {dimension_numbers = #tpu.dot_dimension_numbers<[2], [1], [1], [2], [0, 0, 0, 1, 1, 2], [0], [0]>} : vector<4x8x8xf32>, vector<4x8x8xf32>, vector<4x8x8xf32> -> vector<4x8x8xf32>
    "tpu.trace_stop"() : () -> ()
    %118 = vector.shape_cast %117 : vector<4x8x8xf32> to vector<32x8xf32>
    %c24 = arith.constant 24 : index
    %c0_55 = arith.constant 0 : index
    %119 = vector.load %arg7[%c24, %c0_55] : memref<32x32xf32, #tpu.memory_space<vmem>>, vector<8x32xf32>
    %cst_56 = arith.constant dense<0.000000e+00> : vector<32x32xf32>
    %120 = tpu.matmul %118, %119, %cst_56 {dimension_numbers = #tpu.dot_dimension_numbers<[1], [0], [0], [1], [0, 0, 1, 1], [], []>} : vector<32x8xf32>, vector<8x32xf32>, vector<32x32xf32> -> vector<32x32xf32>
    %121 = arith.addf %96, %120 : vector<32x32xf32>
    %122 = vector.shape_cast %121 : vector<32x32xf32> to vector<4x8x32xf32>
    %c0_57 = arith.constant 0 : index
    %c0_58 = arith.constant 0 : index
    %c0_59 = arith.constant 0 : index
    %123 = vector.load %arg9[%c0_57, %c0_58, %c0_59] : memref<4x8x32xf32, #tpu.memory_space<vmem>>, vector<4x8x32xf32>
    tpu.vector_store %arg9[%c0_57, %c0_58, %c0_59], %122 {strides = array<i32>} : memref<4x8x32xf32, #tpu.memory_space<vmem>>, vector<4x8x32xf32>,
    return
  }
  func.func @transform_0(%arg0: i32) -> (i32, i32, i32) {
    %c0_i32 = arith.constant 0 : i32
    %c0_i32_0 = arith.constant 0 : i32
    %c0_i32_1 = arith.constant 0 : i32
    return %arg0, %c0_i32, %c0_i32_0 : i32, i32, i32
  }
  func.func @transform_1(%arg0: i32) -> (i32, i32, i32) {
    %c0_i32 = arith.constant 0 : i32
    %c0_i32_0 = arith.constant 0 : i32
    %c0_i32_1 = arith.constant 0 : i32
    return %arg0, %c0_i32, %c0_i32_0 : i32, i32, i32
  }
  func.func @transform_2(%arg0: i32) -> (i32, i32) {
    %c0_i32 = arith.constant 0 : i32
    %c0_i32_0 = arith.constant 0 : i32
    %c0_i32_1 = arith.constant 0 : i32
    return %c0_i32, %c0_i32_0 : i32, i32
  }
  func.func @transform_3(%arg0: i32) -> (i32, i32) {
    %c0_i32 = arith.constant 0 : i32
    %c0_i32_0 = arith.constant 0 : i32
    %c0_i32_1 = arith.constant 0 : i32
    return %c0_i32, %c0_i32_0 : i32, i32
  }
  func.func @transform_4(%arg0: i32) -> (i32, i32) {
    %c0_i32 = arith.constant 0 : i32
    %c0_i32_0 = arith.constant 0 : i32
    %c0_i32_1 = arith.constant 0 : i32
    return %c0_i32, %c0_i32_0 : i32, i32
  }
  func.func @transform_5(%arg0: i32) -> (i32, i32) {
    %c0_i32 = arith.constant 0 : i32
    %c0_i32_0 = arith.constant 0 : i32
    %c0_i32_1 = arith.constant 0 : i32
    return %c0_i32, %c0_i32_0 : i32, i32
  }
  func.func @transform_6(%arg0: i32) -> (i32, i32) {
    %c0_i32 = arith.constant 0 : i32
    %c0_i32_0 = arith.constant 0 : i32
    %c0_i32_1 = arith.constant 0 : i32
    return %c0_i32, %c0_i32_0 : i32, i32
  }
  func.func @transform_7(%arg0: i32) -> (i32, i32) {
    %c0_i32 = arith.constant 0 : i32
    %c0_i32_0 = arith.constant 0 : i32
    %c0_i32_1 = arith.constant 0 : i32
    return %c0_i32, %c0_i32_0 : i32, i32
  }
  func.func @transform_8(%arg0: i32) -> (i32, i32, i32) {
    %c0_i32 = arith.constant 0 : i32
    %c0_i32_0 = arith.constant 0 : i32
    %c0_i32_1 = arith.constant 0 : i32
    return %arg0, %c0_i32, %c0_i32_0 : i32, i32, i32
  }
}

</mosaic_0001>

<bundles_post_ra>
// kernel: tpu_custom_call.1
= control target key start
LH: loop header
LB: loop body
LE: loop exit
PB: predicated region body
PF: predicated region fallthrough
CT: control target
= control target key end

     0   :  { %s5377_s0 = inlined_call_operand.hbm [shape: f32[8,8,32], index: 0, kind: input, shape index: {}]   ;;  %s5378_s1 = inlined_call_operand.hbm [shape: f32[8,8,32], index: 1, kind: input, shape index: {}]   ;;  %s5379_s2 = inlined_call_operand.hbm [shape: f32[32,32], index: 2, kind: input, shape index: {}]   ;;  %s5380_s3 = inlined_call_operand.vmem [shape: f32[1,32], index: 3, kind: input, shape index: {}]   ;;  %s5381_s4 = inlined_call_operand.hbm [shape: f32[32,64], index: 4, kind: input, shape index: {}]   ;;  %s5382_s5 = inlined_call_operand.vmem [shape: f32[1,64], index: 5, kind: input, shape index: {}]   ;;  %s5383_s6 = inlined_call_operand.hbm [shape: f32[32,32], index: 6, kind: input, shape index: {}]   ;;  %s5384_s7 = inlined_call_operand.vmem [shape: f32[1,32], index: 7, kind: input, shape index: {}]   ;;  %s5385_s8 = inlined_call_operand.hbm [shape: f32[8,8,32], index: 8, kind: output, shape index: {}]  }
   0x1   :  { %5395 = sst [smem:[#allocation20_spill]] %s5377_s0 }
   0x2   :  { %5396 = sst [smem:[#allocation21_spill]] %s5379_s2 }
   0x3   :  { %5397 = sst [smem:[#allocation22_spill]] %s5381_s4 }
   0x4   :  { %5398 = sst [smem:[#allocation23_spill]] %s5383_s6 }
   0x5   :  { %13 = vsyncpa [#allocation3], 0 }
   0x6   :  { %15 = vsyncpa [#allocation3 + $0x1], 0 }
   0x7   :  { %16 = vsyncpa [#allocation6], 0 }
   0x8   :  { %18 = vsyncpa [#allocation6 + $0x1], 0 }
   0x9   :  { %19 = vsyncpa [#allocation9], 0 }
   0xa   :  { %20 = vsyncpa [#allocation4], 0 }
   0xb   :  { %22 = vsyncpa [#allocation4 + $0x1], 0  ;;  %s4742_s27 = smov 0   ;;  %s4744_s28 = smov 0  }
   0xc   :  { %s4746_s29 = smov 0   ;;  %s4748_s30 = smov 0  }
   0xd LB: > { %5399 = sst [smem:[#allocation17_spill]] %s4664_s27  ;;  %s4763_s9 = sadd.s32 4294967295, %s4676_s30   ;;  %s4676_s30 = sphi %s4748_s30, %s5430_s30   ;;  %s4672_s29 = sphi %s4746_s29, %s5429_s29   ;;  %s4668_s28 = sphi %s4744_s28, %s5428_s28   ;;  %s4664_s27 = sphi %s4742_s27, %s5427_s27  }
   0xe   : > { %s3841_s10 = sadd.s32 4294967294, %s4676_s30   ;;  %p48_p0 = scmp.ne.s32.totalorder %s4668_s28, %s4664_s27 }
   0xf   : > { %p5386_p1 = scmp.eq.s32.totalorder %s4763_s9, 0  ;;  %p230_p3 = scmp.eq.s32.totalorder %s3841_s10, 1 }
  0x10   : > { %p3842_p5 = scmp.ge.s32.totalorder %s4676_s30, 1  ;;  %p237_p7 = scmp.lt.s32.totalorder %s4676_s30, 3 }
  0x11   : > { %p4772_p4 = por %p5386_p1, %p48_p0  ;;  %p4777_p6 = por %p230_p3, %p48_p0 }
  0x12   : > { %p4782_p8 = pnand %p3842_p5, %p237_p7  ;;  %s4678_s14 = smov [#allocation7]  }
  0x13   : > { %s5400_s11 = scalar_select %p4772_p4, 1, 0 }
  0x14   : > { %s5401_s12 = scalar_select %p4777_p6, 1, 0 }
  0x15   : > { %s5403_s13 = scalar_select %p4782_p8, 1, 0 }
  0x16   : > { %5402 = sst [smem:[#allocation18_spill]] %s5401_s12  ;;  %s249_s15 = sshll.u32 %s4678_s14, 4  ;;  %s4786_s15 = int_to_ptr.vmem [resolvable:$true] %s249_s15 }
  0x17   : > { %p4313_p9 = pneg %p4782_p8  ;;  %s4679_s17 = smov [#allocation8]  }
  0x18   : > { %s265_s18 = sshll.u32 %s4679_s17, 4  ;;  %s4680_s19 = smov [#allocation10]   ;;  %s4797_s18 = int_to_ptr.vmem [resolvable:$true] %s265_s18 }
  0x19   : > { %p4793_p11 = pnand %p4313_p9, %p5386_p1  ;;  %s4799_s20 = sshll.u32 %s4680_s19, 4  ;;  %s282_s20 = int_to_ptr.vmem [resolvable:$true] %s4799_s20 }
  0x1a   : > { %s5405_s2 = sld [smem:[#allocation21_spill]] }
  0x1b   : > { %p4809_p13 = pneg %p4793_p11 }
  0x20   : > { %s4454_s23 = scalar_lea.hbm %s5405_s2, 512 }
  0x21   : > { %p4455_p12 = scmp.ne.s32.totalorder %s5405_s2, %s4454_s23  ;;  %p4461_p5 = scmp.lt.u32.totalorder %s4454_s23, %s5405_s2 }
  0x23   : > { %p4457_p0 = pnand %p4809_p13, %p4455_p12 }
  0x25   : > { %p4458_p3 = pneg %p4457_p0 }
  0x27   : > { %p4463_p7 = pnand %p4461_p5, %p4458_p3 }
  0x29   : > { %4466 = shalt.err (!%p4463_p7)
}
  0x2a   : > { %s4467_s17 = scalar_lea.vmem %s4786_s15, 512  ;;  %p4475_p2 = scmp.lt.s32.totalorder %s4786_s15, %s4786_s15 }
  0x2b   : > { %p4468_p9 = scmp.ne.s32.totalorder %s4786_s15, %s4467_s17  ;;  %p4476_p6 = scmp.lt.s32.totalorder %s4467_s17, %s4467_s17 }
  0x2d   : > { %p4470_p10 = pnand %p4468_p9, %p4809_p13  ;;  %p4477_p12 = por %p4476_p6, %p4475_p2 }
  0x2f   : > { %p4471_p1 = pneg %p4470_p10 }
  0x31   : > { %p4478_p0 = pnand %p4477_p12, %p4471_p1 }
  0x33   : > { %4481 = shalt.err (!%p4478_p0)
}
  0x34   : > { %s5391_s19 = smov 128   ;;  %s5393_s21 = smov 8  }
  0x35   : > { %4316 = dma.hbm_to_vmem [thread:$0]  (!%p4793_p11), %s5405_s2, 512, %s4786_s15, [#allocation6], %s5391_s19, %s5391_s19, %s5393_s21  }
  0x36   : > { %s5407_s4 = sld [smem:[#allocation22_spill]] }
  0x3c   : > { %s4482_s10 = scalar_lea.hbm %s5407_s4, 512 }
  0x3d   : > { %p4483_p1 = scmp.ne.s32.totalorder %s5407_s4, %s4482_s10  ;;  %p4489_p10 = scmp.lt.u32.totalorder %s4482_s10, %s5407_s4 }
  0x3f   : > { %p4485_p2 = pnand %p4483_p1, %p4809_p13 }
  0x41   : > { %p4486_p6 = pneg %p4485_p2 }
  0x43   : > { %p4491_p3 = pnand %p4489_p10, %p4486_p6 }
  0x45   : > { %4494 = shalt.err (!%p4491_p3)
}
  0x46   : > { %s4495_s15 = scalar_lea.vmem %s4797_s18, 512  ;;  %p4503_p12 = scmp.lt.s32.totalorder %s4797_s18, %s4797_s18 }
  0x47   : > { %p4496_p5 = scmp.ne.s32.totalorder %s4797_s18, %s4495_s15  ;;  %p4504_p0 = scmp.lt.s32.totalorder %s4495_s15, %s4495_s15 }
  0x49   : > { %p4498_p7 = pnand %p4496_p5, %p4809_p13  ;;  %p4505_p1 = por %p4504_p0, %p4503_p12 }
  0x4b   : > { %p4499_p9 = pneg %p4498_p7 }
  0x4d   : > { %p4506_p2 = pnand %p4505_p1, %p4499_p9 }
  0x4f   : > { %4509 = shalt.err (!%p4506_p2)
}
  0x50   : > { %4319 = dma.hbm_to_vmem [thread:$0]  (!%p4793_p11), %s5407_s4, 512, %s4797_s18, [#allocation9], %s5391_s19, %s5391_s19, %s5393_s21  }
  0x51   : > { %s5408_s6 = sld [smem:[#allocation23_spill]] }
  0x57   : > { %s4510_s24 = scalar_lea.hbm %s5408_s6, 512 }
  0x58   : > { %p4511_p6 = scmp.ne.s32.totalorder %s5408_s6, %s4510_s24  ;;  %p4517_p5 = scmp.lt.u32.totalorder %s4510_s24, %s5408_s6 }
  0x5a   : > { %p4513_p10 = pnand %p4511_p6, %p4809_p13 }
  0x5c   : > { %p4514_p3 = pneg %p4513_p10 }
  0x5e   : > { %p4519_p7 = pnand %p4517_p5, %p4514_p3 }
  0x60   : > { %4522 = shalt.err (!%p4519_p7)
}
  0x61   : > { %s4523_s15 = scalar_lea.vmem %s282_s20, 512  ;;  %p4531_p1 = scmp.lt.s32.totalorder %s282_s20, %s282_s20 }
  0x62   : > { %p4524_p9 = scmp.ne.s32.totalorder %s282_s20, %s4523_s15  ;;  %p4532_p2 = scmp.lt.s32.totalorder %s4523_s15, %s4523_s15 }
  0x64   : > { %p4526_p12 = pnand %p4524_p9, %p4809_p13  ;;  %p4533_p4 = por %p4532_p2, %p4531_p1 }
  0x66   : > { %p4527_p0 = pneg %p4526_p12 }
  0x68   : > { %p4534_p8 = pnand %p4533_p4, %p4527_p0 }
  0x6a   : > { %4537 = shalt.err (!%p4534_p8)
}
  0x6b   : > { %4322 = dma.hbm_to_vmem [thread:$0]  (!%p4793_p11), %s5408_s6, 512, %s282_s20, [#allocation9], %s5391_s19, %s5391_s19, %s5393_s21  }
  0x6c   : > { %s4882_s26 = sadd.s32 1, %s4676_s30   ;;  %s35_s12 = sadd.s32 1, %s4672_s29 }
  0x6d   : > { %s32_s16 = ssub.s32 %s4676_s30, %s4882_s26  ;;  %p42_p8 = scmp.ne.s32.totalorder %s4672_s29, %s4668_s28 }
  0x6e   : > { %p33_p4 = scmp.eq.s32.totalorder %s32_s16, 0  ;;  %p43_p13 = scmp.eq.s32.totalorder %s4676_s30, 0 }
  0x6f   : > { %p4337_p6 = scmp.lt.s32.totalorder %s4676_s30, 2  ;;  %p5410_p3 = scmp.eq.s32.totalorder %s4763_s9, 1 }
  0x70   : > { %s4892_s22 = scalar_select %p33_p4, %s4672_s29, %s35_s12  }
  0x71   : > { %p44_p10 = por %p43_p13, %p42_p8  ;;  %p4896_p5 = por %p5410_p3, %p42_p8 }
  0x72   : > { %5409 = sst [smem:[#allocation19_spill]] %s4892_s22  ;;  %s298_s24 = sand.u32 1, %s4672_s29  }
  0x73   : > { %s3940_s25 = sshll.u32 %s4676_s30, 9  ;;  %s4902_s20 = sshll.u32 %s298_s24, 5 }
  0x74   : > { %s5412_s0 = sld [smem:[#allocation20_spill]]  ;;  %s302_s15 = scalar_lea.vmem [#allocation2], %s4902_s20 }
  0x75   : > { %s309_s18 = sshll.u32 %s302_s15, 4  ;;  %p4910_p11 = pnand %p4337_p6, %p44_p10  ;;  %s4914_s18 = int_to_ptr.vmem [resolvable:$true] %s309_s18 }
  0x76   : > { %s4919_s10 = scalar_lea.hbm %s5378_s1, %s3940_s25  ;;  %s4921_s14 = scalar_lea.sflag [#allocation3], %s298_s24 }
  0x77   : > { %p4540_p9 = pneg %p4910_p11 }
  0x7a   : > { %s4907_s17 = scalar_lea.hbm %s5412_s0, %s3940_s25  ;;  %s4543_s2 = scalar_lea.hbm %s5412_s0, 1024 }
  0x7b   : > { %s4538_s19 = scalar_lea.hbm %s4907_s17, 512  ;;  %p4544_p1 = scmp.lt.u32.totalorder %s4907_s17, %s5412_s0 }
  0x7c   : > { %p4539_p7 = scmp.ne.s32.totalorder %s4907_s17, %s4538_s19  ;;  %p4545_p2 = scmp.lt.u32.totalorder %s4543_s2, %s4538_s19 }
  0x7d   : > { %p4547_p8 = scmp.lt.u32.totalorder %s4538_s19, %s4907_s17 }
  0x7e   : > { %p4541_p12 = pnand %p4540_p9, %p4539_p7  ;;  %p4546_p4 = por %p4545_p2, %p4544_p1 }
  0x80   : > { %p4542_p0 = pneg %p4541_p12  ;;  %p4548_p13 = por %p4547_p8, %p4546_p4 }
  0x82   : > { %p4549_p6 = pnand %p4548_p13, %p4542_p0 }
  0x84   : > { %4552 = shalt.err (!%p4549_p6)
}
  0x85   : > { %s4553_s24 = scalar_lea.vmem %s4914_s18, 512  ;;  %s4683_s21 = smov [#allocation2]  }
  0x86   : > { %p4554_p10 = scmp.ne.s32.totalorder %s4914_s18, %s4553_s24  ;;  %s4558_s25 = sshll.u32 %s4683_s21, 4  ;;  %s4559_s25 = int_to_ptr.vmem [resolvable:$false] %s4558_s25 }
  0x87   : > { %s4560_s4 = scalar_lea.vmem %s4559_s25, 1024  ;;  %p4561_p12 = scmp.lt.s32.totalorder %s4914_s18, %s4559_s25 }
  0x88   : > { %p4556_p3 = pnand %p4554_p10, %p4540_p9  ;;  %p4562_p1 = scmp.lt.s32.totalorder %s4560_s4, %s4553_s24 }
  0x8a   : > { %p4557_p7 = pneg %p4556_p3  ;;  %p4563_p2 = por %p4562_p1, %p4561_p12 }
  0x8c   : > { %p4564_p4 = pnand %p4563_p2, %p4557_p7 }
  0x8e   : > { %4567 = shalt.err (!%p4564_p4)
}
  0x8f   : > { %s5414_s2 = smov 8   ;;  %s5415_s6 = smov 128  }
  0x90   : > { %4326 = dma.hbm_to_vmem [thread:$0]  (!%p4910_p11), %s4907_s17, 512, %s4914_s18, %s4921_s14, %s5415_s6, %s5415_s6, %s5414_s2  }
  0x91   : > { %s323_s19 = scalar_lea.vmem [#allocation5], %s4902_s20  ;;  %s319_s12 = sand.u32 1, %s4676_s30  }
  0x92   : > { %s330_s16 = sshll.u32 %s323_s19, 4  ;;  %s4956_s15 = scalar_lea.sflag [#allocation6], %s319_s12  ;;  %s4954_s16 = int_to_ptr.vmem [resolvable:$true] %s330_s16 }
  0x93   : > { %s4568_s24 = scalar_lea.hbm %s4919_s10, 512  ;;  %s4573_s4 = scalar_lea.hbm %s5378_s1, 1024 }
  0x94   : > { %p4569_p0 = scmp.ne.s32.totalorder %s4919_s10, %s4568_s24  ;;  %p4574_p6 = scmp.lt.u32.totalorder %s4919_s10, %s5378_s1 }
  0x95   : > { %p4575_p10 = scmp.lt.u32.totalorder %s4573_s4, %s4568_s24  ;;  %p4577_p7 = scmp.lt.u32.totalorder %s4568_s24, %s4919_s10 }
  0x96   : > { %p4571_p8 = pnand %p4569_p0, %p4540_p9 }
  0x97   : > { %p4576_p3 = por %p4575_p10, %p4574_p6 }
  0x98   : > { %p4572_p13 = pneg %p4571_p8 }
  0x99   : > { %p4578_p12 = por %p4577_p7, %p4576_p3 }
  0x9b   : > { %p4579_p1 = pnand %p4578_p12, %p4572_p13 }
  0x9d   : > { %4582 = shalt.err (!%p4579_p1)
}
  0x9e   : > { %s4583_s20 = scalar_lea.vmem %s4954_s16, 512  ;;  %s4684_s17 = smov [#allocation5]  }
  0x9f   : > { %p4584_p2 = scmp.ne.s32.totalorder %s4954_s16, %s4583_s20  ;;  %s4588_s18 = sshll.u32 %s4684_s17, 4  ;;  %s4589_s18 = int_to_ptr.vmem [resolvable:$false] %s4588_s18 }
  0xa0   : > { %s4590_s0 = scalar_lea.vmem %s4589_s18, 1024  ;;  %p4591_p8 = scmp.lt.s32.totalorder %s4954_s16, %s4589_s18 }
  0xa1   : > { %p4586_p4 = pnand %p4584_p2, %p4540_p9  ;;  %p4592_p6 = scmp.lt.s32.totalorder %s4590_s0, %s4583_s20 }
  0xa3   : > { %p4587_p0 = pneg %p4586_p4  ;;  %p4593_p10 = por %p4592_p6, %p4591_p8 }
  0xa5   : > { %p4594_p3 = pnand %p4593_p10, %p4587_p0 }
  0xa7   : > { %4597 = shalt.err (!%p4594_p3)
}
  0xa8   : > { %4329 = dma.hbm_to_vmem [thread:$0]  (!%p4910_p11), %s4919_s10, 512, %s4954_s16, %s4956_s15, %s5415_s6, %s5415_s6, %s5414_s2  }
  0xa9   : > { %p5416_p9 = scmp.ne.s32.totalorder %s5403_s13, 0 }
  0xaa   : > { %s4988_s22 = sand.u32 (!%p5416_p9), 1, %s4668_s28   ;;  %p5417_p13 = scmp.ne.s32.totalorder (!%p5416_p9), %s5400_s11, 0 }
  0xab   : > { %342 = sbr.rel (%p5416_p9) target bundleno = 3056 (0xbf0), region = 52  ;;  %s4991_s14 = sshll.u32 (!%p5416_p9), %s4988_s22, 5 }
  0xac   : > { %s345_s27 = scalar_lea.sflag (!%p5416_p9), [#allocation3], %s4988_s22  ;;  %s4995_s19 = scalar_lea.vmem (!%p5416_p9), [#allocation2], %s4991_s14 }
  0xb2   : > { %4643 = dma.done.wait (%p5417_p13), %s345_s27, 512  }
  0xb3   : > { %4645 = vsyncadd (%p5417_p13), %s345_s27, 4294966784  ;;  %s353_s13 = sand.u32 1, %s4763_s9   ;;  %s5003_s2 = scalar_lea.vmem [#allocation5], %s4991_s14 }
  0xb4   : > { %s354_s10 = scalar_lea.sflag [#allocation6], %s353_s13 }
  0xb5   : > { %4647 = dma.done.wait (%p5417_p13), %s354_s10, 512  }
  0xb6   : > { %4649 = vsyncadd (%p5417_p13), %s354_s10, 4294966784  ;;  %p5418_p11 = scmp.eq.s32.totalorder %s4763_s9, 0 }
  0xb8   : > { %4651 = dma.done.wait (%p5418_p11), [#allocation6], 512   ;;  %p5419_p7 = pmov %p5418_p11 }
  0xba   : > { %4653 = vsyncadd (%p5419_p7), [#allocation6], 4294966784  ;;  %p5420_p12 = pmov %p5419_p7 }
  0xbb   : > { %p5421_p1 = pmov %p5419_p7 }
  0xbc   : > { %4655 = dma.done.wait (%p5420_p12), [#allocation9], 1024  }
  0xbd   : > { %4657 = vsyncadd (%p5421_p1), [#allocation9], 4294966272  ;;  %v529_v0 = vld [vmem:[#allocation8] sm:$0xff]  ;;  %v530_v1 = vld [vmem:[#allocation8 + $0x8] sm:$0xff]  ;;  %vm431_vm0 = vcmask 261120   ;;  %v4685_v20 = vmov 0.0  }
  0xbe   : > { %v421_v2 = vld [vmem:[#allocation7] sm:$0xff]  ;;  %v4271_v3 = vpack.c.bf16 %v530_v1, %v529_v0  ;;  %v422_v4 = vld [vmem:[#allocation7 + $0x8] sm:$0xff]  ;;  %v531_v5 = vld [vmem:[#allocation8 + $0x10] sm:$0xff]  ;;  %vm4686_vm1 = vmmov 0   ;;  %vm642_vm2 = vcmask 64512   ;;  %s4687_s15 = smov 96  }
  0xbf   : > { %v532_v6 = vld [vmem:[#allocation8 + $0x18] sm:$0xff]  ;;  %v4263_v7 = vpack.c.bf16 %v422_v4, %v421_v2  ;;  %v423_v9 = vld [vmem:[#allocation7 + $0x10] sm:$0xff]  ;;  %v414_v11 = vld [vmem:[%s5003_s2] sm:$0xff]  ;;  %s4688_s24 = smov 120   ;;  %s4689_s21 = smov 88  }
  0xc0   : > { %v4275_v8 = vpack.c.bf16 %v532_v6, %v531_v5  ;;  %v424_v10 = vld [vmem:[#allocation7 + $0x18] sm:$0xff]  ;;  %4272 = vmatprep.subr.bf16.mxu1 %v4271_v3  ;;  %4065 = vmatprep.mubr.msk.f32.mxu1 %vm431_vm0, %v414_v11  ;;  %v410_v13 = vld [vmem:[%s4995_s19] sm:$0xff]  ;;  %v415_v14 = vld [vmem:[%s5003_s2 + $0x8] sm:$0xff]  ;;  %s4690_s25 = smov 112   ;;  %s4691_s4 = smov 80  }
  0xc1   : > { %v4267_v12 = vpack.c.bf16 %v424_v10, %v423_v9  ;;  %4274 = vmatpush3.bf16.msra.mxu1 %v4271_v3  ;;  %4264 = vmatprep.subr.bf16.mxu0 %v4263_v7  ;;  %v411_v15 = vld [vmem:[%s4995_s19 + $0x8] sm:$0xff]  ;;  %v416_v16 = vld [vmem:[%s5003_s2 + $0x10] sm:$0xff]  ;;  %v417_v18 = vld [vmem:[%s5003_s2 + $0x18] sm:$0xff]  ;;  %s4692_s20 = smov 104   ;;  %s4693_s17 = smov 72  }
  0xc2   : > { %4266 = vmatpush3.bf16.msra.mxu0 %v4263_v7  ;;  %4276 = vmatprep.subr.bf16.mxu1 %v4275_v8  ;;  %v412_v17 = vld [vmem:[%s4995_s19 + $0x10] sm:$0xff]  ;;  %v413_v19 = vld [vmem:[%s4995_s19 + $0x18] sm:$0xff]  ;;  %v3865_v21 = vld [vmem:[%s5382_s5] ss:$0 sm:$0xff]  ;;  %s406_s27 = scalar_lea.vmem [#allocation11], %s4991_s14  ;;  %s3942_s13 = sshll.u32 %s4763_s9, 9 }
  0xc3   : > { %4268 = vmatprep.subr.bf16.mxu0 %v4267_v12  ;;  %4051 = vmatprep.mubr.msk.f32.mxu0 %vm431_vm0, %v410_v13  ;;  %v3860_v23 = vld [vmem:[%s5380_s3] ss:$0 sm:$0xff]  ;;  %s3717_s19 = sshll.u32 %s406_s27, 4  ;;  %s5331_s11 = scalar_lea.hbm %s5385_s8, %s3942_s13  ;;  %s5326_s19 = int_to_ptr.vmem [resolvable:$true] %s3717_s19 }
  0xc4   : > { %s3704_s14 = scalar_lea.sflag [#allocation4], %s4988_s22  ;;  %s4598_s9 = scalar_lea.vmem %s5326_s19, 512 }
  0xc5   : > { %4278 = vmatpush3.bf16.msra.mxu1 %v4275_v8  ;;  %p4599_p2 = scmp.ne.s32.totalorder %s5326_s19, %s4598_s9  ;;  %s4694_s6 = smov [#allocation11]  }
  0xc6   : > { %4270 = vmatpush3.bf16.msra.mxu0 %v4267_v12  ;;  %4071 = vmatprep.subr.mxu1 %v4685_v20  ;;  %s4602_s16 = sshll.u32 %s4694_s6, 4  ;;  %s4603_s16 = int_to_ptr.vmem [resolvable:$false] %s4602_s16 }
  0xc7   : > { %4081 = vmatprep.subr.mxu0 %v4685_v20  ;;  %p4600_p4 = pnand %p4599_p2, %p4896_p5  ;;  %s4604_s12 = scalar_lea.vmem %s4603_s16, 1024 }
  0xc8   : > { %4066 = vmatmul.mubr.msk.f32.vlgmr.msra.gmra.mrb[0].mxu1 %vm431_vm0, %v415_v14  ;;  %p4605_p8 = scmp.lt.s32.totalorder %s5326_s19, %s4603_s16  ;;  %p4606_p6 = scmp.lt.s32.totalorder %s4604_s12, %s4598_s9 }
  0xc9   : > { %4052 = vmatmul.mubr.msk.f32.vlgmr.msra.gmra.mrb[0].mxu0 %vm431_vm0, %v411_v15  ;;  %4068 = vmatprep.mubr.msk.f32.mxu1 %vm431_vm0, %v416_v16  ;;  %p4601_p0 = pneg %p4600_p4 }
  0xca   : > { %4054 = vmatprep.mubr.msk.f32.mxu0 %vm431_vm0, %v412_v17  ;;  %v1299_v17 = vld [vmem:[#allocation10] sm:$0xff]  ;;  %p4607_p10 = por %p4606_p6, %p4605_p8 }
  0xcc   : > { %4069 = vmatmul.mubr.msk.f32.gmra.mrb[2].mxu1 %vm431_vm0, %v417_v18  ;;  %p4608_p3 = pnand %p4607_p10, %p4601_p0 }
  0xcd   : > { %4055 = vmatmul.mubr.msk.f32.gmra.mrb[2].mxu0 %vm431_vm0, %v413_v19  ;;  %4073 = vmatprep.mubr.msk.f32.mxu1 %vm4686_vm1, %v4685_v20 }
  0xce   : > { %4083 = vmatprep.mubr.msk.f32.mxu0 %vm4686_vm1, %v4685_v20 }
 0x19b   : > { %v4067_v22 = vpop.f32.mrb[0].mxu1 }
 0x19c   : > { %v5045_v24 = vadd.f32 %v4067_v22, %v3865_v21  ;;  %v617_v25 = vpop.f32.mrb[1].mxu1  ;;  %v4053_v26 = vpop.f32.mrb[0].mxu0 }
 0x19d   : > { %v5047_v27 = vadd.f32 %v3865_v21, %v617_v25  ;;  %v510_v28 = vpop.f32.mrb[1].mxu0  ;;  %v5066_v36 = vadd.f32 %v4053_v26, %v3860_v23 }
 0x19e   : > { %1071 = vrot.lane.b32.xlu1 %v5045_v24, %s4687_s15  ;;  %v5051_v29 = vadd.f32 %v3860_v23, %v510_v28 }
 0x19f   : > { %v4070_v30 = vpop.f32.mrb[2].mxu1  ;;  %4072 = vmatpush3.xpose.msk.msra.mxu1 %vm642_vm2, %v5047_v27 }
 0x1a0   : > { %v627_v31 = vpop.f32.mrb[3].mxu1  ;;  %v4056_v32 = vpop.f32.mrb[2].mxu0  ;;  %4076 = vmatprep.subr.mxu1 %v4685_v20  ;;  %v5072_v37 = vadd.f32 %v4070_v30, %v3865_v21 }
 0x1a1   : > { %v5056_v33 = vadd.f32 %v3865_v21, %v627_v31  ;;  %v520_v34 = vpop.f32.mrb[3].mxu0  ;;  %v5082_v38 = vadd.f32 %v4056_v32, %v3860_v23 }
 0x1a2   : > { %4074 = vmatmul.mubr.msk.f32.vlgmr.msra.gmra.mrb[4].mxu1 %vm642_vm2, %v5051_v29  ;;  %v5062_v35 = vadd.f32 %v3860_v23, %v520_v34 }
 0x1a3   : > { %1147 = vrot.lane.b32.xlu1 %v5056_v33, %s4687_s15  ;;  %4077 = vmatpush3.xpose.msk.msra.mxu1 %vm642_vm2, %v5045_v24 }
 0x1a4   : > { %4082 = vmatpush3.xpose.msk.msra.mxu0 %vm642_vm2, %v5056_v33  ;;  %4078 = vmatprep.mubr.msk.f32.mxu1 %vm4686_vm1, %v4685_v20 }
 0x1a5   : > { %4086 = vmatprep.subr.mxu1 %v4685_v20  ;;  %4091 = vmatprep.subr.mxu0 %v4685_v20 }
 0x1a6   : > { %4079 = vmatmul.mubr.msk.f32.vlgmr.msra.gmra.mrb[6].mxu1 %vm642_vm2, %v5066_v36 }
 0x1a7   : > { %4084 = vmatmul.mubr.msk.f32.vlgmr.msra.gmra.mrb[4].mxu0 %vm642_vm2, %v5062_v35  ;;  %4087 = vmatpush3.xpose.msk.msra.mxu1 %vm642_vm2, %v5072_v37 }
 0x1a8   : > { %4088 = vmatprep.mubr.msk.f32.mxu1 %vm4686_vm1, %v4685_v20  ;;  %4096 = vmatprep.subr.mxu1 %v4685_v20 }
 0x1a9   : > { %4093 = vmatprep.mubr.msk.f32.mxu0 %vm4686_vm1, %v4685_v20 }
 0x1aa   : > { %4089 = vmatmul.mubr.msk.f32.vlgmr.msra.gmra.mrb[8].mxu1 %vm642_vm2, %v5082_v38 }
 0x1ab   : > { %4098 = vmatprep.mubr.msk.f32.mxu1 %vm4686_vm1, %v4685_v20 }
 0x210   : > { %v1072_v39 = vpop.permute.xlu1 %1071 }
 0x211   : > { %4097 = vmatpush3.msra.mxu1 %v1072_v39 }
 0x212   : > { %4106 = vmatprep.subr.mxu1 %v4685_v20 }
 0x215   : > { %v1148_v9 = vpop.permute.xlu1 %1147 }
 0x275   : > { %v715_v40 = vpop.f32.mrb[4].mxu1 }
 0x276   : > { %v947_v41 = vmul.f32 0.35355338, %v715_v40  ;;  %v4075_v42 = vpop.f32.mrb[5].mxu1 }
 0x278   : > { %v959_v43 = vsub.f32 1.0, %v947_v41  ;;  %v955_v56 = vadd.f32 1.0, %v947_v41  ;;  %vm951_vm3 = vcmp.ge.f32.partialorder %v947_v41, 0.0 }
 0x279   : > { %v791_v44 = vpop.f32.mrb[6].mxu1 }
 0x27a   : > { %4390 = vrcp.f32 %v959_v43  ;;  %v948_v45 = vmul.f32 0.35355338, %v791_v44  ;;  %v867_v46 = vpop.f32.mrb[4].mxu0  ;;  %v4080_v47 = vpop.f32.mrb[7].mxu1 }
 0x27b   : > { %v949_v48 = vmul.f32 0.35355338, %v867_v46  ;;  %v4085_v49 = vpop.f32.mrb[5].mxu0 }
 0x27c   : > { %v960_v50 = vsub.f32 1.0, %v948_v45  ;;  %v956_v60 = vadd.f32 1.0, %v948_v45  ;;  %vm952_vm4 = vcmp.ge.f32.partialorder %v948_v45, 0.0 }
 0x27d   : > { %v961_v51 = vsub.f32 1.0, %v949_v48  ;;  %v943_v52 = vpop.f32.mrb[8].mxu1  ;;  %v957_v62 = vadd.f32 1.0, %v949_v48  ;;  %vm953_vm5 = vcmp.ge.f32.partialorder %v949_v48, 0.0 }
 0x27e   : > { %4392 = vrcp.f32 %v960_v50  ;;  %v950_v53 = vmul.f32 0.35355338, %v943_v52  ;;  %v4090_v54 = vpop.f32.mrb[9].mxu1 }
 0x27f   : > { %4394 = vrcp.f32 %v961_v51 }
 0x280   : > { %v962_v55 = vsub.f32 1.0, %v950_v53  ;;  %v958_v3 = vadd.f32 1.0, %v950_v53  ;;  %vm954_vm6 = vcmp.ge.f32.partialorder %v950_v53, 0.0 }
 0x282   : > { %4396 = vrcp.f32 %v962_v55 }
 0x284   : > { %v4391_v57 = vpop.eup %4390 }
 0x285   : > { %v971_v58 = vsel %vm951_vm3, %v955_v56, %v4391_v57 }
 0x286   : > { %v975_v59 = vsel %vm642_vm2, %v971_v58, 0.0 }
 0x287   : > { %976 = vadd.xlane.f32.xlu0 %v975_v59 }
 0x288   : > { %v4393_v61 = vpop.eup %4392 }
 0x289   : > { %v4395_v63 = vpop.eup %4394  ;;  %v972_v0 = vsel %vm952_vm4, %v956_v60, %v4393_v61 }
 0x28a   : > { %v973_v1 = vsel %vm953_vm5, %v957_v62, %v4395_v63  ;;  %v978_v2 = vsel %vm642_vm2, %v972_v0, 0.0 }
 0x28b   : > { %v981_v4 = vsel %vm642_vm2, %v973_v1, 0.0  ;;  %979 = vadd.xlane.f32.xlu0 %v978_v2 }
 0x28c   : > { %v4397_v5 = vpop.eup %4396  ;;  %982 = vadd.xlane.f32.xlu1 %v981_v4 }
 0x28d   : > { %v974_v6 = vsel %vm954_vm6, %v958_v3, %v4397_v5 }
 0x28e   : > { %v984_v7 = vsel %vm642_vm2, %v974_v6, 0.0 }
 0x290   : > { %985 = vadd.xlane.f32.xlu1 %v984_v7 }
 0x2a1   : > { %1223 = vrot.lane.b32.xlu1 %v5072_v37, %s4687_s15  ;;  %995 = vrot.lane.b32.xlu0 %v5047_v27, %s4687_s15 }
 0x2a5   : > { %1401 = vrot.lane.b32.xlu1 %v5051_v29, %s4688_s24  ;;  %1403 = vrot.lane.b32.xlu0 %v5047_v27, %s4688_s24 }
 0x2a9   : > { %1479 = vrot.lane.b32.xlu1 %v5066_v36, %s4688_s24  ;;  %1481 = vrot.lane.b32.xlu0 %v5045_v24, %s4688_s24 }
 0x2ad   : > { %1637 = vrot.lane.b32.xlu1 %v5072_v37, %s4688_s24  ;;  %1559 = vrot.lane.b32.xlu0 %v5056_v33, %s4688_s24 }
 0x2b1   : > { %1635 = vrot.lane.b32.xlu1 %v5082_v38, %s4688_s24  ;;  %1557 = vrot.lane.b32.xlu0 %v5062_v35, %s4688_s24 }
 0x314   : > { %v977_v8 = vpop.xlane.xlu0 %976 }
 0x315   : > { %4398 = vrcp.f32 %v977_v8 }
 0x318   : > { %v980_v10 = vpop.xlane.xlu0 %979 }
 0x319   : > { %v983_v11 = vpop.xlane.xlu1 %982  ;;  %4400 = vrcp.f32 %v980_v10 }
 0x31a   : > { %4402 = vrcp.f32 %v983_v11 }
 0x31c   : > { %v996_v12 = vpop.permute.xlu0 %995 }
 0x31d   : > { %v986_v13 = vpop.xlane.xlu1 %985  ;;  %4092 = vmatpush3.msra.mxu0 %v996_v12 }
 0x31e   : > { %4404 = vrcp.f32 %v986_v13  ;;  %4101 = vmatprep.subr.mxu0 %v4685_v20 }
 0x31f   : > { %v4399_v14 = vpop.eup %4398 }
 0x320   : > { %v991_v15 = vmul.f32 %v4399_v14, %v971_v58  ;;  %v1404_v28 = vpop.permute.xlu0 %1403 }
 0x321   : > { %v1224_v16 = vpop.permute.xlu1 %1223 }
 0x322   : > { %4094 = vmatmul.mubr.msk.f32.vlgmr.msra.gmra.mrb[6].mxu0 %vm642_vm2, %v991_v15 }
 0x323   : > { %v4401_v18 = vpop.eup %4400  ;;  %4102 = vmatpush3.msra.mxu0 %v1148_v9  ;;  %4103 = vmatprep.mubr.msk.f32.mxu0 %vm4686_vm1, %v4685_v20 }
 0x324   : > { %v4403_v19 = vpop.eup %4402  ;;  %v992_v21 = vmul.f32 %v4401_v18, %v972_v0  ;;  %4111 = vmatprep.subr.mxu0 %v1299_v17  ;;  %v1482_v31 = vpop.permute.xlu0 %1481 }
 0x325   : > { %v993_v22 = vmul.f32 %v4403_v19, %v973_v1  ;;  %v1402_v23 = vpop.permute.xlu1 %1401 }
 0x326   : > { %4099 = vmatmul.mubr.msk.f32.vlgmr.msra.gmra.mrb[10].mxu1 %vm642_vm2, %v992_v21 }
 0x327   : > { %4104 = vmatmul.mubr.msk.f32.vlgmr.msra.gmra.mrb[8].mxu0 %vm642_vm2, %v993_v22  ;;  %4107 = vmatpush3.msra.mxu1 %v1224_v16 }
 0x328   : > { %v4405_v25 = vpop.eup %4404  ;;  %4108 = vmatprep.mubr.msk.f32.mxu1 %vm4686_vm1, %v4685_v20  ;;  %4119 = vmatprep.subr.mxu1 %v4685_v20  ;;  %v1560_v41 = vpop.permute.xlu0 %1559 }
 0x329   : > { %v994_v26 = vmul.f32 %v4405_v25, %v974_v6  ;;  %4112 = vmatpush3.msra.mxu0 %v1299_v17  ;;  %v1480_v30 = vpop.permute.xlu1 %1479 }
 0x32a   : > { %4129 = vmatprep.subr.mxu0 %v4685_v20 }
 0x32b   : > { %4109 = vmatmul.mubr.msk.f32.vlgmr.msra.gmra.mrb[12].mxu1 %vm642_vm2, %v994_v26 }
 0x32c   : > { %4121 = vmatprep.mubr.msk.f32.mxu1 %vm4686_vm1, %v4685_v20  ;;  %v1558_v48 = vpop.permute.xlu0 %1557 }
 0x32d   : > { %v1638_v32 = vpop.permute.xlu1 %1637 }
 0x32e   : > { %4120 = vmatpush3.xpose.msk.msra.mxu1 %vm642_vm2, %v1404_v28 }
 0x32f   : > { %4124 = vmatprep.subr.mxu1 %v4685_v20 }
 0x331   : > { %4122 = vmatmul.mubr.msk.f32.vlgmr.msra.gmra.mrb[14].mxu1 %vm642_vm2, %v1402_v23  ;;  %v1636_v34 = vpop.permute.xlu1 %1635 }
 0x332   : > { %4125 = vmatpush3.xpose.msk.msra.mxu1 %vm642_vm2, %v1482_v31  ;;  %4126 = vmatprep.mubr.msk.f32.mxu1 %vm4686_vm1, %v4685_v20 }
 0x333   : > { %4134 = vmatprep.subr.mxu1 %v4685_v20 }
 0x335   : > { %4127 = vmatmul.mubr.msk.f32.vlgmr.msra.gmra.mrb[16].mxu1 %vm642_vm2, %v1480_v30 }
 0x336   : > { %4135 = vmatpush3.xpose.msk.msra.mxu1 %vm642_vm2, %v1638_v32  ;;  %4136 = vmatprep.mubr.msk.f32.mxu1 %vm4686_vm1, %v4685_v20 }
 0x337   : > { %4144 = vmatprep.subr.mxu1 %v4685_v20 }
 0x339   : > { %4137 = vmatmul.mubr.msk.f32.vlgmr.msra.gmra.mrb[18].mxu1 %vm642_vm2, %v1636_v34 }
 0x33a   : > { %4146 = vmatprep.mubr.msk.f32.mxu1 %vm4686_vm1, %v4685_v20 }
 0x3f5   : > { %v1067_v39 = vpop.f32.mrb[6].mxu0 }
 0x3f6   : > { %v4095_v40 = vpop.f32.mrb[7].mxu0  ;;  %4113 = vmatprep.mubr.msk.f32.mxu0 %vm642_vm2, %v1067_v39 }
 0x3f9   : > { %v1143_v42 = vpop.f32.mrb[10].mxu1 }
 0x3fa   : > { %v1219_v43 = vpop.f32.mrb[8].mxu0  ;;  %v4100_v44 = vpop.f32.mrb[11].mxu1  ;;  %4114 = vmatmul.mubr.msk.f32.vlgmr.msra.gmra.mrb[10].mxu0 %vm642_vm2, %v1143_v42 }
 0x3fb   : > { %v4105_v45 = vpop.f32.mrb[9].mxu0  ;;  %4130 = vmatpush3.xpose.msk.msra.mxu0 %vm642_vm2, %v1560_v41  ;;  %4116 = vmatprep.mubr.msk.f32.mxu0 %vm642_vm2, %v1219_v43  ;;  %v2065_v41 = vld [vmem:[#allocation10 + $0x8] sm:$0xff] }
 0x3fc   : > { %4139 = vmatprep.subr.mxu0 %v4685_v20 }
 0x3fe   : > { %v1295_v46 = vpop.f32.mrb[12].mxu1 }
 0x3ff   : > { %v4110_v47 = vpop.f32.mrb[13].mxu1  ;;  %4117 = vmatmul.mubr.msk.f32.gmra.mrb[12].mxu0 %vm642_vm2, %v1295_v46 }
 0x400   : > { %4131 = vmatprep.mubr.msk.f32.mxu0 %vm4686_vm1, %v4685_v20 }
 0x403   : > { %4132 = vmatmul.mubr.msk.f32.vlgmr.msra.gmra.mrb[14].mxu0 %vm642_vm2, %v1558_v48 }
 0x404   : > { %v1475_v49 = vpop.f32.mrb[14].mxu1  ;;  %4141 = vmatprep.mubr.msk.f32.mxu0 %vm4686_vm1, %v4685_v20 }
 0x405   : > { %v1713_v50 = vmul.f32 0.35355338, %v1475_v49  ;;  %v4123_v51 = vpop.f32.mrb[15].mxu1 }
 0x407   : > { %v1725_v52 = vsub.f32 1.0, %v1713_v50  ;;  %v1721_v61 = vadd.f32 1.0, %v1713_v50  ;;  %vm1717_vm7 = vcmp.ge.f32.partialorder %v1713_v50, 0.0 }
 0x408   : > { %v1553_v53 = vpop.f32.mrb[16].mxu1 }
 0x409   : > { %4406 = vrcp.f32 %v1725_v52  ;;  %v1714_v54 = vmul.f32 0.35355338, %v1553_v53  ;;  %v4128_v55 = vpop.f32.mrb[17].mxu1 }
 0x40b   : > { %v1726_v56 = vsub.f32 1.0, %v1714_v54  ;;  %v1722_v1 = vadd.f32 1.0, %v1714_v54  ;;  %vm1718_vm8 = vcmp.ge.f32.partialorder %v1714_v54, 0.0 }
 0x40c   : > { %v1709_v57 = vpop.f32.mrb[18].mxu1 }
 0x40d   : > { %4408 = vrcp.f32 %v1726_v56  ;;  %v1716_v58 = vmul.f32 0.35355338, %v1709_v57  ;;  %v4138_v59 = vpop.f32.mrb[19].mxu1 }
 0x40f   : > { %v1728_v60 = vsub.f32 1.0, %v1716_v58  ;;  %v1724_v5 = vadd.f32 1.0, %v1716_v58  ;;  %vm1720_vm9 = vcmp.ge.f32.partialorder %v1716_v58, 0.0 }
 0x411   : > { %4410 = vrcp.f32 %v1728_v60 }
 0x413   : > { %v4407_v62 = vpop.eup %4406 }
 0x414   : > { %v5149_v63 = vsel %vm1717_vm7, %v1721_v61, %v4407_v62 }
 0x415   : > { %v1741_v0 = vsel %vm642_vm2, %v5149_v63, 0.0 }
 0x416   : > { %1742 = vadd.xlane.f32.xlu0 %v1741_v0 }
 0x417   : > { %v4409_v2 = vpop.eup %4408 }
 0x418   : > { %v1738_v3 = vsel %vm1718_vm8, %v1722_v1, %v4409_v2 }
 0x419   : > { %v1744_v4 = vsel %vm642_vm2, %v1738_v3, 0.0 }
 0x41a   : > { %1745 = vadd.xlane.f32.xlu1 %v1744_v4 }
 0x41b   : > { %v4411_v6 = vpop.eup %4410 }
 0x41c   : > { %v1740_v7 = vsel %vm1720_vm9, %v1724_v5, %v4411_v6 }
 0x41d   : > { %v1750_v8 = vsel %vm642_vm2, %v1740_v7, 0.0 }
 0x41e   : > { %1751 = vadd.xlane.f32.xlu0 %v1750_v8 }
 0x42b   : > { %1837 = vrot.lane.b32.xlu1 %v5045_v24, %s4689_s21 }
 0x42f   : > { %1913 = vrot.lane.b32.xlu1 %v5056_v33, %s4689_s21 }
 0x433   : > { %1989 = vrot.lane.b32.xlu1 %v5072_v37, %s4689_s21 }
 0x437   : > { %2167 = vrot.lane.b32.xlu1 %v5051_v29, %s4690_s25 }
 0x43b   : > { %2245 = vrot.lane.b32.xlu1 %v5066_v36, %s4690_s25 }
 0x43f   : > { %2403 = vrot.lane.b32.xlu1 %v5072_v37, %s4690_s25 }
 0x443   : > { %2401 = vrot.lane.b32.xlu1 %v5082_v38, %s4690_s25 }
 0x4a3   : > { %v1743_v9 = vpop.xlane.xlu0 %1742 }
 0x4a7   : > { %v1746_v10 = vpop.xlane.xlu1 %1745 }
 0x4a8   : > { %4412 = vrcp.f32 %v1746_v10 }
 0x4ab   : > { %v1838_v11 = vpop.permute.xlu1 %1837  ;;  %v1752_v12 = vpop.xlane.xlu0 %1751 }
 0x4ac   : > { %4414 = vrcp.f32 %v1752_v12  ;;  %4145 = vmatpush3.msra.mxu1 %v1838_v11 }
 0x4ad   : > { %4154 = vmatprep.subr.mxu1 %v4685_v20 }
 0x4af   : > { %v1914_v13 = vpop.permute.xlu1 %1913 }
 0x4b2   : > { %v4413_v14 = vpop.eup %4412 }
 0x4b3   : > { %v1758_v15 = vmul.f32 %v4413_v14, %v1738_v3  ;;  %v1990_v16 = vpop.permute.xlu1 %1989 }
 0x4b5   : > { %4147 = vmatmul.mubr.msk.f32.vlgmr.msra.gmra.mrb[20].mxu1 %vm642_vm2, %v1758_v15 }
 0x4b6   : > { %v4415_v17 = vpop.eup %4414  ;;  %4155 = vmatpush3.msra.mxu1 %v1990_v16  ;;  %4156 = vmatprep.mubr.msk.f32.mxu1 %vm4686_vm1, %v4685_v20 }
 0x4b7   : > { %v1760_v18 = vmul.f32 %v4415_v17, %v1740_v7  ;;  %4167 = vmatprep.subr.mxu1 %v4685_v20  ;;  %v2168_v34 = vpop.permute.xlu1 %2167 }
 0x4b9   : > { %4157 = vmatmul.mubr.msk.f32.vlgmr.msra.gmra.mrb[22].mxu1 %vm642_vm2, %v1760_v18 }
 0x4ba   : > { %4169 = vmatprep.mubr.msk.f32.mxu1 %vm4686_vm1, %v4685_v20 }
 0x4bb   : > { %v2246_v42 = vpop.permute.xlu1 %2245 }
 0x4bf   : > { %v2404_v47 = vpop.permute.xlu1 %2403 }
 0x4c3   : > { %v2402_v48 = vpop.permute.xlu1 %2401 }
 0x4d6   : > { %v1631_v19 = vpop.f32.mrb[14].mxu0 }
 0x4d7   : > { %v1715_v21 = vmul.f32 0.35355338, %v1631_v19  ;;  %v4133_v22 = vpop.f32.mrb[15].mxu0 }
 0x4d9   : > { %v1727_v23 = vsub.f32 1.0, %v1715_v21  ;;  %v1723_v25 = vadd.f32 1.0, %v1715_v21  ;;  %vm1719_vm10 = vcmp.ge.f32.partialorder %v1715_v21, 0.0 }
 0x4db   : > { %4416 = vrcp.f32 %v1727_v23 }
 0x4dc   : > { %4418 = vrcp.f32 %v1743_v9 }
 0x4e5   : > { %v4417_v26 = vpop.eup %4416 }
 0x4e6   : > { %v1739_v28 = vsel %vm1719_vm10, %v1723_v25, %v4417_v26  ;;  %v4419_v32 = vpop.eup %4418 }
 0x4e7   : > { %v1747_v30 = vsel %vm642_vm2, %v1739_v28, 0.0  ;;  %v1757_v39 = vmul.f32 %v4419_v32, %v5149_v63 }
 0x4e8   : > { %1748 = vadd.xlane.f32.xlu0 %v1747_v30 }
 0x4fe   : > { %1761 = vrot.lane.b32.xlu0 %v5047_v27, %s4689_s21 }
 0x502   : > { %2169 = vrot.lane.b32.xlu0 %v5047_v27, %s4690_s25 }
 0x506   : > { %2247 = vrot.lane.b32.xlu0 %v5045_v24, %s4690_s25 }
 0x50a   : > { %2325 = vrot.lane.b32.xlu0 %v5056_v33, %s4690_s25 }
 0x50e   : > { %2323 = vrot.lane.b32.xlu0 %v5062_v35, %s4690_s25 }
 0x575   : > { %v1749_v31 = vpop.xlane.xlu0 %1748 }
 0x576   : > { %4420 = vrcp.f32 %v1749_v31 }
 0x579   : > { %v1762_v40 = vpop.permute.xlu0 %1761 }
 0x57a   : > { %4140 = vmatpush3.msra.mxu0 %v1762_v40 }
 0x57b   : > { %4142 = vmatmul.mubr.msk.f32.vlgmr.msra.gmra.mrb[16].mxu0 %vm642_vm2, %v1757_v39  ;;  %4149 = vmatprep.subr.mxu0 %v4685_v20 }
 0x57c   : > { %4150 = vmatpush3.msra.mxu0 %v1914_v13  ;;  %4151 = vmatprep.mubr.msk.f32.mxu0 %vm4686_vm1, %v4685_v20 }
 0x57d   : > { %v2170_v43 = vpop.permute.xlu0 %2169  ;;  %4159 = vmatprep.subr.mxu0 %v2065_v41 }
 0x57e   : > { %4168 = vmatpush3.xpose.msk.msra.mxu1 %vm642_vm2, %v2170_v43 }
 0x57f   : > { %4172 = vmatprep.subr.mxu1 %v4685_v20 }
 0x580   : > { %v4421_v44 = vpop.eup %4420 }
 0x581   : > { %v1759_v45 = vmul.f32 %v4421_v44, %v1739_v28  ;;  %4170 = vmatmul.mubr.msk.f32.vlgmr.msra.gmra.mrb[24].mxu1 %vm642_vm2, %v2168_v34  ;;  %v2248_v46 = vpop.permute.xlu0 %2247 }
 0x582   : > { %4173 = vmatpush3.xpose.msk.msra.mxu1 %vm642_vm2, %v2248_v46  ;;  %4174 = vmatprep.mubr.msk.f32.mxu1 %vm4686_vm1, %v4685_v20 }
 0x583   : > { %4152 = vmatmul.mubr.msk.f32.vlgmr.msra.gmra.mrb[18].mxu0 %vm642_vm2, %v1759_v45  ;;  %4182 = vmatprep.subr.mxu1 %v4685_v20 }
 0x584   : > { %4160 = vmatpush3.msra.mxu0 %v2065_v41 }
 0x585   : > { %4175 = vmatmul.mubr.msk.f32.vlgmr.msra.gmra.mrb[26].mxu1 %vm642_vm2, %v2246_v42  ;;  %4177 = vmatprep.subr.mxu0 %v4685_v20  ;;  %v2326_v55 = vpop.permute.xlu0 %2325 }
 0x586   : > { %4183 = vmatpush3.xpose.msk.msra.mxu1 %vm642_vm2, %v2404_v47  ;;  %4184 = vmatprep.mubr.msk.f32.mxu1 %vm4686_vm1, %v4685_v20 }
 0x587   : > { %4192 = vmatprep.subr.mxu1 %v4685_v20 }
 0x588   : > { %v1909_v49 = vpop.f32.mrb[20].mxu1 }
 0x589   : > { %4185 = vmatmul.mubr.msk.f32.vlgmr.msra.gmra.mrb[28].mxu1 %vm642_vm2, %v2402_v48  ;;  %v4148_v50 = vpop.f32.mrb[21].mxu1  ;;  %v2324_v1 = vpop.permute.xlu0 %2323  ;;  %v2831_v48 = vld [vmem:[#allocation10 + $0x10] sm:$0xff] }
 0x58a   : > { %4194 = vmatprep.mubr.msk.f32.mxu1 %vm4686_vm1, %v4685_v20 }
 0x58c   : > { %v2061_v51 = vpop.f32.mrb[22].mxu1 }
 0x58d   : > { %v4158_v52 = vpop.f32.mrb[23].mxu1 }
 0x64e   : > { %v1833_v53 = vpop.f32.mrb[16].mxu0 }
 0x64f   : > { %v4143_v54 = vpop.f32.mrb[17].mxu0  ;;  %4161 = vmatprep.mubr.msk.f32.mxu0 %vm642_vm2, %v1833_v53 }
 0x650   : > { %4162 = vmatmul.mubr.msk.f32.vlgmr.msra.gmra.mrb[10].mxu0 %vm642_vm2, %v1909_v49 }
 0x651   : > { %4178 = vmatpush3.xpose.msk.msra.mxu0 %vm642_vm2, %v2326_v55 }
 0x652   : > { %4187 = vmatprep.subr.mxu0 %v4685_v20 }
 0x654   : > { %v2241_v56 = vpop.f32.mrb[24].mxu1 }
 0x655   : > { %v2479_v57 = vmul.f32 0.35355338, %v2241_v56  ;;  %v4171_v58 = vpop.f32.mrb[25].mxu1 }
 0x656   : > { %v1985_v59 = vpop.f32.mrb[18].mxu0 }
 0x657   : > { %v2491_v60 = vsub.f32 1.0, %v2479_v57  ;;  %v4153_v61 = vpop.f32.mrb[19].mxu0  ;;  %4164 = vmatprep.mubr.msk.f32.mxu0 %vm642_vm2, %v1985_v59  ;;  %v2487_v7 = vadd.f32 1.0, %v2479_v57  ;;  %vm2483_vm11 = vcmp.ge.f32.partialorder %v2479_v57, 0.0 }
 0x658   : > { %4165 = vmatmul.mubr.msk.f32.gmra.mrb[12].mxu0 %vm642_vm2, %v2061_v51  ;;  %v2319_v62 = vpop.f32.mrb[26].mxu1 }
 0x659   : > { %4422 = vrcp.f32 %v2491_v60  ;;  %v2480_v63 = vmul.f32 0.35355338, %v2319_v62  ;;  %v4176_v0 = vpop.f32.mrb[27].mxu1  ;;  %4179 = vmatprep.mubr.msk.f32.mxu0 %vm4686_vm1, %v4685_v20 }
 0x65b   : > { %v2492_v2 = vsub.f32 1.0, %v2480_v63  ;;  %v2488_v11 = vadd.f32 1.0, %v2480_v63  ;;  %vm2484_vm12 = vcmp.ge.f32.partialorder %v2480_v63, 0.0 }
 0x65c   : > { %4180 = vmatmul.mubr.msk.f32.vlgmr.msra.gmra.mrb[20].mxu0 %vm642_vm2, %v2324_v1  ;;  %v2475_v3 = vpop.f32.mrb[28].mxu1 }
 0x65d   : > { %4424 = vrcp.f32 %v2492_v2  ;;  %v2482_v4 = vmul.f32 0.35355338, %v2475_v3  ;;  %v4186_v5 = vpop.f32.mrb[29].mxu1  ;;  %4189 = vmatprep.mubr.msk.f32.mxu0 %vm4686_vm1, %v4685_v20 }
 0x65f   : > { %v2494_v6 = vsub.f32 1.0, %v2482_v4  ;;  %v2490_v15 = vadd.f32 1.0, %v2482_v4  ;;  %vm2486_vm13 = vcmp.ge.f32.partialorder %v2482_v4, 0.0 }
 0x661   : > { %4426 = vrcp.f32 %v2494_v6 }
 0x663   : > { %v4423_v8 = vpop.eup %4422 }
 0x664   : > { %v5221_v9 = vsel %vm2483_vm11, %v2487_v7, %v4423_v8 }
 0x665   : > { %v2507_v10 = vsel %vm642_vm2, %v5221_v9, 0.0 }
 0x666   : > { %2508 = vadd.xlane.f32.xlu0 %v2507_v10 }
 0x667   : > { %v4425_v12 = vpop.eup %4424 }
 0x668   : > { %v2504_v13 = vsel %vm2484_vm12, %v2488_v11, %v4425_v12 }
 0x669   : > { %v2510_v14 = vsel %vm642_vm2, %v2504_v13, 0.0 }
 0x66a   : > { %2511 = vadd.xlane.f32.xlu1 %v2510_v14 }
 0x66b   : > { %v4427_v16 = vpop.eup %4426 }
 0x66c   : > { %v2506_v17 = vsel %vm2486_vm13, %v2490_v15, %v4427_v16 }
 0x66d   : > { %v2516_v18 = vsel %vm642_vm2, %v2506_v17, 0.0 }
 0x66e   : > { %2517 = vadd.xlane.f32.xlu0 %v2516_v18 }
 0x67b   : > { %2603 = vrot.lane.b32.xlu1 %v5045_v24, %s4691_s4 }
 0x67f   : > { %2679 = vrot.lane.b32.xlu1 %v5056_v33, %s4691_s4 }
 0x683   : > { %2755 = vrot.lane.b32.xlu1 %v5072_v37, %s4691_s4 }
 0x687   : > { %2933 = vrot.lane.b32.xlu1 %v5051_v29, %s4692_s20 }
 0x68b   : > { %3011 = vrot.lane.b32.xlu1 %v5066_v36, %s4692_s20 }
 0x68f   : > { %3169 = vrot.lane.b32.xlu1 %v5072_v37, %s4692_s20 }
 0x693   : > { %3167 = vrot.lane.b32.xlu1 %v5082_v38, %s4692_s20 }
 0x6f3   : > { %v2509_v19 = vpop.xlane.xlu0 %2508 }
 0x6f7   : > { %v2512_v21 = vpop.xlane.xlu1 %2511 }
 0x6f8   : > { %4428 = vrcp.f32 %v2512_v21 }
 0x6fb   : > { %v2604_v22 = vpop.permute.xlu1 %2603  ;;  %v2518_v23 = vpop.xlane.xlu0 %2517 }
 0x6fc   : > { %4430 = vrcp.f32 %v2518_v23  ;;  %4193 = vmatpush3.msra.mxu1 %v2604_v22 }
 0x6fd   : > { %4202 = vmatprep.subr.mxu1 %v4685_v20 }
 0x6ff   : > { %v2680_v25 = vpop.permute.xlu1 %2679 }
 0x702   : > { %v4429_v29 = vpop.eup %4428 }
 0x703   : > { %v2524_v26 = vmul.f32 %v4429_v29, %v2504_v13  ;;  %v2756_v28 = vpop.permute.xlu1 %2755 }
 0x705   : > { %4195 = vmatmul.mubr.msk.f32.vlgmr.msra.gmra.mrb[30].mxu1 %vm642_vm2, %v2524_v26 }
 0x706   : > { %v4431_v36 = vpop.eup %4430  ;;  %4203 = vmatpush3.msra.mxu1 %v2756_v28  ;;  %4204 = vmatprep.mubr.msk.f32.mxu1 %vm4686_vm1, %v4685_v20 }
 0x707   : > { %v2526_v38 = vmul.f32 %v4431_v36, %v2506_v17  ;;  %4215 = vmatprep.subr.mxu1 %v4685_v20  ;;  %v2934_v45 = vpop.permute.xlu1 %2933 }
 0x709   : > { %4205 = vmatmul.mubr.msk.f32.vlgmr.msra.gmra.mrb[32].mxu1 %vm642_vm2, %v2526_v38 }
 0x70a   : > { %4217 = vmatprep.mubr.msk.f32.mxu1 %vm4686_vm1, %v4685_v20 }
 0x70b   : > { %v3012_v49 = vpop.permute.xlu1 %3011 }
 0x70f   : > { %v3170_v55 = vpop.permute.xlu1 %3169 }
 0x713   : > { %v3168_v58 = vpop.permute.xlu1 %3167 }
 0x72f   : > { %v2397_v30 = vpop.f32.mrb[20].mxu0 }
 0x730   : > { %v2481_v31 = vmul.f32 0.35355338, %v2397_v30  ;;  %v4181_v32 = vpop.f32.mrb[21].mxu0 }
 0x732   : > { %v2493_v34 = vsub.f32 1.0, %v2481_v31  ;;  %v2489_v39 = vadd.f32 1.0, %v2481_v31  ;;  %vm2485_vm14 = vcmp.ge.f32.partialorder %v2481_v31, 0.0 }
 0x734   : > { %4432 = vrcp.f32 %v2493_v34 }
 0x735   : > { %4434 = vrcp.f32 %v2509_v19 }
 0x73e   : > { %v4433_v40 = vpop.eup %4432 }
 0x73f   : > { %v2505_v41 = vsel %vm2485_vm14, %v2489_v39, %v4433_v40  ;;  %v4435_v44 = vpop.eup %4434 }
 0x740   : > { %v2513_v42 = vsel %vm642_vm2, %v2505_v41, 0.0  ;;  %v2523_v46 = vmul.f32 %v4435_v44, %v5221_v9 }
 0x741   : > { %2514 = vadd.xlane.f32.xlu0 %v2513_v42 }
 0x757   : > { %2527 = vrot.lane.b32.xlu0 %v5047_v27, %s4691_s4 }
 0x75b   : > { %2935 = vrot.lane.b32.xlu0 %v5047_v27, %s4692_s20 }
 0x75f   : > { %3013 = vrot.lane.b32.xlu0 %v5045_v24, %s4692_s20 }
 0x763   : > { %3091 = vrot.lane.b32.xlu0 %v5056_v33, %s4692_s20 }
 0x767   : > { %3089 = vrot.lane.b32.xlu0 %v5062_v35, %s4692_s20 }
 0x7ce   : > { %v2515_v43 = vpop.xlane.xlu0 %2514 }
 0x7cf   : > { %4436 = vrcp.f32 %v2515_v43 }
 0x7d2   : > { %v2528_v47 = vpop.permute.xlu0 %2527 }
 0x7d3   : > { %4188 = vmatpush3.msra.mxu0 %v2528_v47 }
 0x7d4   : > { %4190 = vmatmul.mubr.msk.f32.vlgmr.msra.gmra.mrb[22].mxu0 %vm642_vm2, %v2523_v46  ;;  %4197 = vmatprep.subr.mxu0 %v4685_v20 }
 0x7d5   : > { %4198 = vmatpush3.msra.mxu0 %v2680_v25  ;;  %4199 = vmatprep.mubr.msk.f32.mxu0 %vm4686_vm1, %v4685_v20 }
 0x7d6   : > { %v2936_v35 = vpop.permute.xlu0 %2935  ;;  %4207 = vmatprep.subr.mxu0 %v2831_v48 }
 0x7d7   : > { %4216 = vmatpush3.xpose.msk.msra.mxu1 %vm642_vm2, %v2936_v35 }
 0x7d8   : > { %v2675_v50 = vpop.f32.mrb[30].mxu1  ;;  %4220 = vmatprep.subr.mxu1 %v4685_v20 }
 0x7d9   : > { %v4437_v51 = vpop.eup %4436  ;;  %v4196_v52 = vpop.f32.mrb[31].mxu1 }
 0x7da   : > { %v2525_v53 = vmul.f32 %v4437_v51, %v2505_v41  ;;  %4218 = vmatmul.mubr.msk.f32.vlgmr.msra.gmra.mrb[34].mxu1 %vm642_vm2, %v2934_v45  ;;  %v3014_v54 = vpop.permute.xlu0 %3013 }
 0x7db   : > { %4221 = vmatpush3.xpose.msk.msra.mxu1 %vm642_vm2, %v3014_v54  ;;  %4222 = vmatprep.mubr.msk.f32.mxu1 %vm4686_vm1, %v4685_v20  ;;  %v3597_v54 = vld [vmem:[#allocation10 + $0x18] sm:$0xff] }
 0x7dc   : > { %4200 = vmatmul.mubr.msk.f32.vlgmr.msra.gmra.mrb[24].mxu0 %vm642_vm2, %v2525_v53  ;;  %v2827_v56 = vpop.f32.mrb[32].mxu1  ;;  %4230 = vmatprep.subr.mxu1 %v4685_v20 }
 0x7dd   : > { %v4206_v57 = vpop.f32.mrb[33].mxu1  ;;  %4208 = vmatpush3.msra.mxu0 %v2831_v48 }
 0x7de   : > { %4223 = vmatmul.mubr.msk.f32.vlgmr.msra.gmra.mrb[36].mxu1 %vm642_vm2, %v3012_v49  ;;  %4225 = vmatprep.subr.mxu0 %v4685_v20  ;;  %v3092_v61 = vpop.permute.xlu0 %3091 }
 0x7df   : > { %4231 = vmatpush3.xpose.msk.msra.mxu1 %vm642_vm2, %v3170_v55  ;;  %4232 = vmatprep.mubr.msk.f32.mxu1 %vm4686_vm1, %v4685_v20 }
 0x7e0   : > { %4240 = vmatprep.subr.mxu1 %v4685_v20 }
 0x7e2   : > { %4233 = vmatmul.mubr.msk.f32.vlgmr.msra.gmra.mrb[38].mxu1 %vm642_vm2, %v3168_v58  ;;  %v3090_v7 = vpop.permute.xlu0 %3089  ;;  %v3870_v58 = vld [vmem:[%s5384_s7] ss:$0 sm:$0xff] }
 0x7e3   : > { %4242 = vmatprep.mubr.msk.f32.mxu1 %vm4686_vm1, %v4685_v20 }
 0x8a7   : > { %v2599_v59 = vpop.f32.mrb[22].mxu0 }
 0x8a8   : > { %v4191_v60 = vpop.f32.mrb[23].mxu0  ;;  %4209 = vmatprep.mubr.msk.f32.mxu0 %vm642_vm2, %v2599_v59 }
 0x8a9   : > { %4210 = vmatmul.mubr.msk.f32.vlgmr.msra.gmra.mrb[10].mxu0 %vm642_vm2, %v2675_v50 }
 0x8aa   : > { %4226 = vmatpush3.xpose.msk.msra.mxu0 %vm642_vm2, %v3092_v61 }
 0x8ab   : > { %4235 = vmatprep.subr.mxu0 %v4685_v20 }
 0x8ad   : > { %v3007_v62 = vpop.f32.mrb[34].mxu1 }
 0x8ae   : > { %v3245_v63 = vmul.f32 0.35355338, %v3007_v62  ;;  %v4219_v0 = vpop.f32.mrb[35].mxu1 }
 0x8af   : > { %v2751_v1 = vpop.f32.mrb[24].mxu0 }
 0x8b0   : > { %v3257_v2 = vsub.f32 1.0, %v3245_v63  ;;  %v4201_v3 = vpop.f32.mrb[25].mxu0  ;;  %4212 = vmatprep.mubr.msk.f32.mxu0 %vm642_vm2, %v2751_v1  ;;  %v3253_v13 = vadd.f32 1.0, %v3245_v63  ;;  %vm3249_vm15 = vcmp.ge.f32.partialorder %v3245_v63, 0.0 }
 0x8b1   : > { %4213 = vmatmul.mubr.msk.f32.gmra.mrb[12].mxu0 %vm642_vm2, %v2827_v56  ;;  %v3085_v4 = vpop.f32.mrb[36].mxu1 }
 0x8b2   : > { %4438 = vrcp.f32 %v3257_v2  ;;  %v3246_v5 = vmul.f32 0.35355338, %v3085_v4  ;;  %v4224_v6 = vpop.f32.mrb[37].mxu1  ;;  %4227 = vmatprep.mubr.msk.f32.mxu0 %vm4686_vm1, %v4685_v20 }
 0x8b4   : > { %v3258_v8 = vsub.f32 1.0, %v3246_v5  ;;  %v3254_v17 = vadd.f32 1.0, %v3246_v5  ;;  %vm3250_vm3 = vcmp.ge.f32.partialorder %v3246_v5, 0.0 }
 0x8b5   : > { %4228 = vmatmul.mubr.msk.f32.vlgmr.msra.gmra.mrb[26].mxu0 %vm642_vm2, %v3090_v7  ;;  %v3241_v9 = vpop.f32.mrb[38].mxu1 }
 0x8b6   : > { %4440 = vrcp.f32 %v3258_v8  ;;  %v3248_v10 = vmul.f32 0.35355338, %v3241_v9  ;;  %v4234_v11 = vpop.f32.mrb[39].mxu1  ;;  %4237 = vmatprep.mubr.msk.f32.mxu0 %vm4686_vm1, %v4685_v20 }
 0x8b8   : > { %v3260_v12 = vsub.f32 1.0, %v3248_v10  ;;  %v3256_v22 = vadd.f32 1.0, %v3248_v10  ;;  %vm3252_vm4 = vcmp.ge.f32.partialorder %v3248_v10, 0.0 }
 0x8ba   : > { %4442 = vrcp.f32 %v3260_v12 }
 0x8bc   : > { %v4439_v14 = vpop.eup %4438 }
 0x8bd   : > { %v3269_v15 = vsel %vm3249_vm15, %v3253_v13, %v4439_v14 }
 0x8be   : > { %v3273_v16 = vsel %vm642_vm2, %v3269_v15, 0.0 }
 0x8bf   : > { %3274 = vadd.xlane.f32.xlu0 %v3273_v16 }
 0x8c0   : > { %v4441_v18 = vpop.eup %4440 }
 0x8c1   : > { %v3270_v19 = vsel %vm3250_vm3, %v3254_v17, %v4441_v18 }
 0x8c2   : > { %v3276_v21 = vsel %vm642_vm2, %v3270_v19, 0.0 }
 0x8c3   : > { %3277 = vadd.xlane.f32.xlu1 %v3276_v21 }
 0x8c4   : > { %v4443_v23 = vpop.eup %4442 }
 0x8c5   : > { %v3272_v25 = vsel %vm3252_vm4, %v3256_v22, %v4443_v23 }
 0x8c6   : > { %v3282_v29 = vsel %vm642_vm2, %v3272_v25, 0.0 }
 0x8c7   : > { %3283 = vadd.xlane.f32.xlu0 %v3282_v29 }
 0x8d4   : > { %3369 = vrot.lane.b32.xlu1 %v5045_v24, %s4693_s17 }
 0x8d8   : > { %3445 = vrot.lane.b32.xlu1 %v5056_v33, %s4693_s17 }
 0x8dc   : > { %3521 = vrot.lane.b32.xlu1 %v5072_v37, %s4693_s17 }
 0x94c   : > { %v3275_v26 = vpop.xlane.xlu0 %3274 }
 0x950   : > { %v3278_v28 = vpop.xlane.xlu1 %3277 }
 0x951   : > { %4444 = vrcp.f32 %v3278_v28 }
 0x954   : > { %v3370_v36 = vpop.permute.xlu1 %3369  ;;  %v3284_v38 = vpop.xlane.xlu0 %3283 }
 0x955   : > { %4446 = vrcp.f32 %v3284_v38  ;;  %4241 = vmatpush3.msra.mxu1 %v3370_v36 }
 0x956   : > { %4250 = vmatprep.subr.mxu1 %v4685_v20 }
 0x958   : > { %v3446_v30 = vpop.permute.xlu1 %3445 }
 0x95b   : > { %v4445_v31 = vpop.eup %4444 }
 0x95c   : > { %v3290_v32 = vmul.f32 %v4445_v31, %v3270_v19  ;;  %v3522_v34 = vpop.permute.xlu1 %3521 }
 0x95e   : > { %4243 = vmatmul.mubr.msk.f32.vlgmr.msra.gmra.mrb[40].mxu1 %vm642_vm2, %v3290_v32 }
 0x95f   : > { %v4447_v24 = vpop.eup %4446  ;;  %4251 = vmatpush3.msra.mxu1 %v3522_v34  ;;  %4252 = vmatprep.mubr.msk.f32.mxu1 %vm4686_vm1, %v4685_v20 }
 0x960   : > { %v3292_v33 = vmul.f32 %v4447_v24, %v3272_v25 }
 0x962   : > { %4253 = vmatmul.mubr.msk.f32.vlgmr.msra.gmra.mrb[42].mxu1 %vm642_vm2, %v3292_v33 }
 0x988   : > { %v3163_v37 = vpop.f32.mrb[26].mxu0 }
 0x989   : > { %v3247_v39 = vmul.f32 0.35355338, %v3163_v37  ;;  %v4229_v40 = vpop.f32.mrb[27].mxu0 }
 0x98b   : > { %v3259_v41 = vsub.f32 1.0, %v3247_v39  ;;  %v3255_v42 = vadd.f32 1.0, %v3247_v39  ;;  %vm3251_vm5 = vcmp.ge.f32.partialorder %v3247_v39, 0.0 }
 0x98d   : > { %4448 = vrcp.f32 %v3259_v41 }
 0x98e   : > { %4450 = vrcp.f32 %v3275_v26 }
 0x997   : > { %v4449_v43 = vpop.eup %4448 }
 0x998   : > { %v3271_v44 = vsel %vm3251_vm5, %v3255_v42, %v4449_v43  ;;  %v4451_v47 = vpop.eup %4450 }
 0x999   : > { %v3279_v45 = vsel %vm642_vm2, %v3271_v44, 0.0  ;;  %v3289_v48 = vmul.f32 %v4451_v47, %v3269_v15 }
 0x99a   : > { %3280 = vadd.xlane.f32.xlu0 %v3279_v45 }
 0x9b0   : > { %3293 = vrot.lane.b32.xlu0 %v5047_v27, %s4693_s17 }
 0xa27   : > { %v3281_v46 = vpop.xlane.xlu0 %3280 }
 0xa28   : > { %4452 = vrcp.f32 %v3281_v46 }
 0xa2b   : > { %v3294_v49 = vpop.permute.xlu0 %3293 }
 0xa2c   : > { %4236 = vmatpush3.msra.mxu0 %v3294_v49 }
 0xa2d   : > { %4238 = vmatmul.mubr.msk.f32.vlgmr.msra.gmra.mrb[28].mxu0 %vm642_vm2, %v3289_v48  ;;  %4245 = vmatprep.subr.mxu0 %v4685_v20 }
 0xa2e   : > { %4246 = vmatpush3.msra.mxu0 %v3446_v30  ;;  %4247 = vmatprep.mubr.msk.f32.mxu0 %vm4686_vm1, %v4685_v20 }
 0xa2f   : > { %4255 = vmatprep.subr.mxu0 %v3597_v54 }
 0xa31   : > { %v3441_v35 = vpop.f32.mrb[40].mxu1 }
 0xa32   : > { %v4453_v50 = vpop.eup %4452  ;;  %v4244_v51 = vpop.f32.mrb[41].mxu1 }
 0xa33   : > { %v3291_v52 = vmul.f32 %v4453_v50, %v3271_v44 }
 0xa35   : > { %4248 = vmatmul.mubr.msk.f32.vlgmr.msra.gmra.mrb[30].mxu0 %vm642_vm2, %v3291_v52  ;;  %v3593_v27 = vpop.f32.mrb[42].mxu1 }
 0xa36   : > { %v4254_v53 = vpop.f32.mrb[43].mxu1  ;;  %4256 = vmatpush3.msra.mxu0 %v3597_v54 }
 0xb00   : > { %v3365_v55 = vpop.f32.mrb[28].mxu0 }
 0xb01   : > { %v4239_v56 = vpop.f32.mrb[29].mxu0  ;;  %4257 = vmatprep.mubr.msk.f32.mxu0 %vm642_vm2, %v3365_v55 }
 0xb02   : > { %4258 = vmatmul.mubr.msk.f32.vlgmr.msra.gmra.mrb[10].mxu0 %vm642_vm2, %v3441_v35 }
 0xb08   : > { %v3517_v20 = vpop.f32.mrb[30].mxu0 }
 0xb09   : > { %v4249_v57 = vpop.f32.mrb[31].mxu0  ;;  %4260 = vmatprep.mubr.msk.f32.mxu0 %vm642_vm2, %v3517_v20 }
 0xb0a   : > { %4261 = vmatmul.mubr.msk.f32.gmra.mrb[12].mxu0 %vm642_vm2, %v3593_v27 }
 0xbd5   : > { %v4259_v59 = vpop.f32.mrb[10].mxu0 }
 0xbd6   : > { %v4279_v60 = vadd.f32 %v4259_v59, %v3870_v58  ;;  %v3676_v61 = vpop.f32.mrb[11].mxu0 }
 0xbd7   : > { %v4280_v62 = vadd.f32 %v3870_v58, %v3676_v61 }
 0xbd8   : > { %3700 = vst.msk [vmem:[%s406_s27 + $0x8] sm:$0xff] %vm431_vm0, %v4279_v60 }
 0xbd9   : > { %3699 = vst.msk [vmem:[%s406_s27] sm:$0xff] %vm431_vm0, %v4280_v62 }
 0xbdd   : > { %v4262_v63 = vpop.f32.mrb[12].mxu0 }
 0xbde   : > { %v4281_v0 = vadd.f32 %v4262_v63, %v3870_v58  ;;  %v3686_v1 = vpop.f32.mrb[13].mxu0 }
 0xbdf   : > { %v4282_v2 = vadd.f32 %v3870_v58, %v3686_v1 }
 0xbe0   : > { %3702 = vst.msk [vmem:[%s406_s27 + $0x18] sm:$0xff] %vm431_vm0, %v4281_v0 }
 0xbe1   : > { %3701 = vst.msk [vmem:[%s406_s27 + $0x10] sm:$0xff] %vm431_vm0, %v4282_v2 }
 0xbe2   : > { %4611 = shalt.err (!%p4608_p3)
}
 0xbe3   : > { %s4612_s15 = scalar_lea.hbm %s5331_s11, 512  ;;  %s4616_s25 = scalar_lea.hbm %s5385_s8, 1024 }
 0xbe4   : > { %p4613_p9 = scmp.ne.s32.totalorder %s5331_s11, %s4612_s15  ;;  %p4617_p7 = scmp.lt.u32.totalorder %s5331_s11, %s5385_s8 }
 0xbe5   : > { %p4618_p12 = scmp.lt.u32.totalorder %s4616_s25, %s4612_s15  ;;  %p4620_p2 = scmp.lt.u32.totalorder %s4612_s15, %s5331_s11 }
 0xbe6   : > { %p4614_p13 = pnand %p4613_p9, %p4896_p5 }
 0xbe7   : > { %p4619_p1 = por %p4618_p12, %p4617_p7 }
 0xbe8   : > { %p4615_p11 = pneg %p4614_p13 }
 0xbe9   : > { %p4621_p4 = por %p4620_p2, %p4619_p1 }
 0xbeb   : > { %p4622_p0 = pnand %p4621_p4, %p4615_p11 }
 0xbed   : > { %4625 = shalt.err (!%p4622_p0)
}
 0xbee   : > { %s4695_s17 = smov 128   ;;  %s4696_s18 = smov 8  }
 0xbef   : > { %4311 = dma.vmem_to_hbm [thread:$0]  (%p4896_p5), %s5326_s19, 512, %s5331_s11, %s3704_s14, %s4695_s17, %s4695_s17, %s4696_s18  }
 0xbf0 PF: > { %s5422_s0 = sld [smem:[#allocation17_spill]]  ;;  %s5423_s27 = sld [smem:[#allocation18_spill]] }
 0xbf1   : > { %p5425_p6 = scmp.ge.s32.totalorder %s4676_s30, 2 }
 0xbf6   : > { %s3732_s13 = sand.u32 1, %s5422_s0   ;;  %p5424_p8 = scmp.ne.s32.totalorder %s5423_s27, 0 }
 0xbf7   : > { %s3733_s10 = scalar_lea.sflag [#allocation4], %s3732_s13 }
 0xbf8   : > { %p4331_p10 = pnand %p5425_p6, %p5424_p8 }
 0xbfa   : > { %4659 = dma.done.wait (!%p4331_p10), %s3733_s10, 512  }
 0xbfb   : > { %4661 = vsyncadd (!%p4331_p10), %s3733_s10, 4294966784  ;;  %s5426_s2 = sld [smem:[#allocation19_spill]]  ;;  %p25_p3 = scmp.ge.s32.totalorder %s4882_s26, 4  }
 0xbfc   : > { %s5427_s27 = smov %s4668_s28  ;;  %s5428_s28 = smov %s4672_s29 }
 0xbfd   : > { %s5430_s30 = smov %s4882_s26  ;;  %27 = sbr.rel (!%p25_p3) target bundleno = 13 (0xd), region = 122 }
 0xc01   : > { %s5429_s29 = smov %s5426_s2 }
 0xc04   :  { %3738 = vsyncpa [#allocation3], 1 }
 0xc05   :  { %3740 = vsyncpa [#allocation3 + $0x1], 1 }
 0xc06   :  { %3741 = vsyncpa [#allocation6], 1 }
 0xc07   :  { %3743 = vsyncpa [#allocation6 + $0x1], 1 }
 0xc08   :  { %3744 = vsyncpa [#allocation9], 1 }
 0xc09   :  { %3745 = vsyncpa [#allocation4], 1 }
 0xc0a   :  { %3747 = vsyncpa [#allocation4 + $0x1], 1 }

</bundles_post_ra>
